<compile_context>
chip_gen: v5e
topology: v5e:2x2
jax: 0.10.0
libtpu: 0.0.40
codegen_flags: <defaults>
</compile_context>

<pallas_src>
import functools

import numpy as np
import jax
import jax.numpy as jnp
from jax import lax
from jax.experimental import pallas as pl
from jax.experimental.pallas import tpu as pltpu


# ----------------------------------------------------------------------------
# Pallas kernel: fused Conv3x3(pad=1) + ReLU + global-mean-pool + Linear head.
#
# Layout (lane-dense): x arrives transposed+flattened as (C_in, B_BLK*F) where
# F is the 128-padded footprint of one zero-padded (H+4)x(W+4) image plane.
# Activations live as (C_out, B_BLK*F): 8 channels on sublanes, batch*spatial
# on lanes.  im2col is done in-kernel: each of the 9 taps is a lane rotation of
# x followed by a (C_out, C_in) x (C_in, B_BLK*F) MXU dot accumulated in f32.
# ----------------------------------------------------------------------------
def _make_kernel(shifts):
    def kernel(x_ref, segmask_ref, wconv_ref, bconv_ref, wfc_ref, bfc_ref,
               out_ref):
        x = x_ref[...].astype(jnp.float32)        # (C_in, B*F); f32 for the lane rotate
        lanes = x.shape[1]

        acc = None
        for k, s in enumerate(shifts):            # 9 static taps, unrolled
            # xs[c, q] = x[c, q + s].  The roll wrap-around only pollutes lane
            # positions that the segment mask zeroes out (interior pixels end
            # >= 42 lanes before each image's F-chunk boundary).
            xs = x if s == 0 else pltpu.roll(x, shift=lanes - s, axis=1)
            acc_k = jnp.dot(wconv_ref[k], xs.astype(jnp.bfloat16),
                            preferred_element_type=jnp.float32)  # (C_out, B*F) f32
            acc = acc_k if acc is None else acc + acc_k

        acts = jnp.maximum(acc + bconv_ref[...], 0.0)             # bias + ReLU, f32

        # Global mean pool per image, fused with the validity mask:
        #   pooled[n, c] = sum_q segmask[n, q] * acts[c, q]
        # segmask holds 1/(H*W) at the interior (valid conv output) positions of
        # image n and 0 everywhere else (padding halo + roll garbage).
        pooled = lax.dot_general(
            segmask_ref[...], acts.astype(jnp.bfloat16),
            dimension_numbers=(((1,), (1,)), ((), ())),
            preferred_element_type=jnp.float32)                   # (B_BLK, C_out) f32

        # Classifier head into a lane-dense 128-wide zero-padded row block.
        logits = jnp.dot(pooled.astype(jnp.bfloat16), wfc_ref[...],
                         preferred_element_type=jnp.float32) + bfc_ref[...]
        out_ref[...] = logits                                     # (B_BLK, C_PAD)
    return kernel


# ----------------------------------------------------------------------------
# Host-side helpers
# ----------------------------------------------------------------------------
def _pick_batch_block(n):
    # Fat tiles first (per-step overhead dominates at these sizes); for larger
    # batches keep B_BLK a multiple of 8 so the (B_BLK, 128) out block is legal
    # and v7x's two TensorCores both get grid steps via "parallel".
    if n <= 16:
        return n
    for b in (16, 8):
        if n % b == 0:
            return b
    return n


def _segment_mask(b_blk, h, w, w_pp, f_len):
    # (B_BLK, B_BLK*F): 1/(H*W) at the interior positions of image n's F-chunk,
    # 0 everywhere else.  Built with numpy once at trace time (compile-time
    # constant).  1/256 is exactly representable in bf16.
    m = np.zeros((b_blk, b_blk * f_len), np.float32)
    inv = 1.0 / float(h * w)
    for n in range(b_blk):
        for i in range(h):
            base = n * f_len + (i + 1) * w_pp + 1
            m[n, base:base + w] = inv
    return m


def _prepare_params(params):
    """Pad/cast PyTorch-layout params into kernel layout ONCE per param version."""
    w_conv = jnp.asarray(params["w_conv"])            # (C_out, C_in, 3, 3)  torch OIHW
    c_out, c_in = int(w_conv.shape[0]), int(w_conv.shape[1])
    # tap-major (9, C_out, C_in): tap k = dh*3 + dw  (matches the in-kernel shifts)
    w_conv_k = jnp.transpose(w_conv, (2, 3, 0, 1)).reshape(9, c_out, c_in)
    w_conv_k = w_conv_k.astype(jnp.bfloat16)
    b_conv = jnp.asarray(params["b_conv"]).reshape(c_out, 1).astype(jnp.float32)

    w_fc = jnp.asarray(params["w_fc"])                # (num_classes, C_out)  torch (out,in)
    n_cls = int(w_fc.shape[0])
    c_pad = pl.cdiv(n_cls, 128) * 128
    w_fc_oc = jnp.zeros((c_out, c_pad), jnp.bfloat16)
    w_fc_oc = w_fc_oc.at[:, :n_cls].set(w_fc.T.astype(jnp.bfloat16))
    b_fc = jnp.zeros((1, c_pad), jnp.float32)
    b_fc = b_fc.at[:, :n_cls].set(jnp.asarray(params["b_fc"]).astype(jnp.float32))
    return {"w_conv_k": w_conv_k, "b_conv": b_conv, "w_fc": w_fc_oc, "b_fc": b_fc}


# ----------------------------------------------------------------------------
# Forward (jitted): cheap XLA glue + one pallas_call over batch blocks.
# ----------------------------------------------------------------------------
@functools.partial(jax.jit, static_argnums=(2,))
def _forward(prep, x, num_classes):
    n, c_in, h, w = x.shape
    c_out = prep["w_conv_k"].shape[1]
    c_pad = prep["w_fc"].shape[1]
    h_pp, w_pp = h + 4, w + 4
    f_len = pl.cdiv(h_pp * w_pp, 128) * 128           # 128-aligned per-image footprint
    b_blk = _pick_batch_block(n)
    assert n % b_blk == 0

    # Host-side glue (fused under jit): zero-pad the image by 2, flatten the
    # spatial dims, pad to F lanes and transpose so channels lead (~1x input
    # bytes of traffic — the 9x im2col patch buffer is gone).
    # TODO(synk): this repack could also move into the kernel with per-row
    # strided DMAs if it ever shows up in profiles.
    x_pp = jnp.pad(x, ((0, 0), (0, 0), (2, 2), (2, 2)))            # (N, C, H+4, W+4)
    x_fl = x_pp.reshape(n, c_in, h_pp * w_pp)
    x_fl = jnp.pad(x_fl, ((0, 0), (0, 0), (0, f_len - h_pp * w_pp)))
    x_k = jnp.transpose(x_fl, (1, 0, 2)).reshape(c_in, n * f_len)
    x_k = x_k.astype(jnp.bfloat16)

    segmask = jnp.asarray(_segment_mask(b_blk, h, w, w_pp, f_len), jnp.bfloat16)

    shifts = tuple(dh * w_pp + dw for dh in range(3) for dw in range(3))
    kernel = _make_kernel(shifts)

    bf = b_blk * f_len
    out = pl.pallas_call(
        kernel,
        out_shape=jax.ShapeDtypeStruct((n, c_pad), jnp.float32),
        grid=(n // b_blk,),
        in_specs=[
            pl.BlockSpec((c_in, bf), lambda i: (0, i)),            # per-step image slab
            pl.BlockSpec((b_blk, bf), lambda i: (0, 0)),           # resident pool/mask matrix
            pl.BlockSpec((9, c_out, c_in), lambda i: (0, 0, 0)),   # resident conv weights
            pl.BlockSpec((c_out, 1), lambda i: (0, 0)),            # conv bias (column)
            pl.BlockSpec((c_out, c_pad), lambda i: (0, 0)),        # fc weights (lane padded)
            pl.BlockSpec((1, c_pad), lambda i: (0, 0)),            # fc bias (lane padded)
        ],
        out_specs=pl.BlockSpec((b_blk, c_pad), lambda i: (i, 0)),
        compiler_params=pltpu.CompilerParams(
            dimension_semantics=("parallel",)),                    # shards steps on v7x
    )(x_k, segmask, prep["w_conv_k"], prep["b_conv"], prep["w_fc"], prep["b_fc"])

    return out[:, :num_classes]                                    # (N, num_classes) f32


# ----------------------------------------------------------------------------
# EMA update: fused, jitted, teacher buffers donated (updated in place).
# ----------------------------------------------------------------------------
@functools.partial(jax.jit, donate_argnums=(0,))
def _ema_update(teacher, student, alpha):
    return jax.tree_util.tree_map(
        lambda t, s: alpha * t + (1.0 - alpha) * s, teacher, student)


# ----------------------------------------------------------------------------
# Pure-JAX f32 reference of the wrapped network (for tolerance checking only).
# ----------------------------------------------------------------------------
def _reference_forward(params, x):
    y = lax.conv_general_dilated(
        x, params["w_conv"], window_strides=(1, 1), padding="SAME",
        dimension_numbers=("NCHW", "OIHW", "NCHW"))
    y = jnp.maximum(y + params["b_conv"][None, :, None, None], 0.0)
    pooled = y.mean(axis=(2, 3))
    return pooled @ params["w_fc"].T + params["b_fc"]


# ----------------------------------------------------------------------------
# MeanTeacher wrapper (mirrors the PyTorch module's semantics)
# ----------------------------------------------------------------------------
class MeanTeacher:
    def __init__(self, student_params, alpha=0.99):
        self.student = student_params
        # deepcopy of the student; the teacher is frozen by construction
        # (JAX arrays are immutable and no gradients are taken through it).
        self.teacher = jax.tree_util.tree_map(jnp.array, student_params)
        self.alpha = alpha
        self.num_classes = int(student_params["w_fc"].shape[0])
        # pad/cast weights into kernel layout once per parameter version
        self._student_prep = _prepare_params(self.student)
        self._teacher_prep = _prepare_params(self.teacher)

    def update_teacher(self):
        self.teacher = _ema_update(self.teacher, self.student, self.alpha)
        self._teacher_prep = _prepare_params(self.teacher)

    def forward(self, x, is_teacher=True):
        prep = self._teacher_prep if is_teacher else self._student_prep
        return _forward(prep, x, self.num_classes)

    __call__ = forward


# ----------------------------------------------------------------------------
# main
# ----------------------------------------------------------------------------
if __name__ == "__main__":
    key = jax.random.PRNGKey(0)
    k_x, k_wc, k_bc, k_wf, k_bf = jax.random.split(key, 5)

    N, C, H, W = 2, 4, 16, 16
    C_OUT, NUM_CLASSES = 8, 10

    # PyTorch-native parameter layouts: Conv2d weight (O, I, kH, kW), Linear (out, in).
    student_params = {
        "w_conv": jax.random.normal(k_wc, (C_OUT, C, 3, 3), jnp.float32) * 0.1,
        "b_conv": jax.random.normal(k_bc, (C_OUT,), jnp.float32) * 0.01,
        "w_fc":   jax.random.normal(k_wf, (NUM_CLASSES, C_OUT), jnp.float32) * 0.1,
        "b_fc":   jax.random.normal(k_bf, (NUM_CLASSES,), jnp.float32) * 0.01,
    }

    model = MeanTeacher(student_params, alpha=0.99)
    x = jax.random.normal(k_x, (N, C, H, W), jnp.float32)   # NCHW like the PyTorch spec

    out_teacher = model(x, is_teacher=True)
    out_student = model(x, is_teacher=False)
    jax.block_until_ready(out_teacher)
    jax.block_until_ready(out_student)

    assert out_teacher.shape == (N, NUM_CLASSES)
    # teacher == student at init (deepcopy semantics)
    assert jnp.allclose(out_teacher, out_student)
    # bf16 MXU operands (f32 accumulation/epilogue): compare against the pure
    # f32 reference with a bf16-appropriate tolerance.
    ref = _reference_forward(student_params, x)
    assert jnp.allclose(out_teacher, ref, rtol=1e-1, atol=5e-2)

    # EMA update (fused, buffers donated) and another teacher forward.
    model.update_teacher()
    jax.block_until_ready(model(x, is_teacher=True))

    print("KERNEL_OK")
</pallas_src>

<mosaic_0001>
module attributes {stable_mosaic.version = 11 : i64} {
  func.func @kernel(%arg0: i32, %arg1: memref<4x1024xbf16, #tpu.memory_space<vmem>>, %arg2: memref<2x1024xbf16, #tpu.memory_space<vmem>>, %arg3: memref<9x8x4xbf16, #tpu.memory_space<vmem>>, %arg4: memref<8x1xf32, #tpu.memory_space<vmem>>, %arg5: memref<8x128xbf16, #tpu.memory_space<vmem>>, %arg6: memref<1x128xf32, #tpu.memory_space<vmem>>, %arg7: memref<2x128xf32, #tpu.memory_space<vmem>>) attributes {dimension_semantics = [#tpu.dimension_semantics<parallel>], iteration_bounds = array<i64: 1>, scalar_prefetch = 0 : i64, scratch_operands = 0 : i64, tpu.core_type = #tpu.core_type<tc>, window_params = [{transform_indices = @transform_0, window_bounds = array<i64: 4, 1024>}, {pipeline_mode = #tpu.pipeline_mode<synchronous>, transform_indices = @transform_1, window_bounds = array<i64: 2, 1024>}, {pipeline_mode = #tpu.pipeline_mode<synchronous>, transform_indices = @transform_2, window_bounds = array<i64: 9, 8, 4>}, {pipeline_mode = #tpu.pipeline_mode<synchronous>, transform_indices = @transform_3, window_bounds = array<i64: 8, 1>}, {pipeline_mode = #tpu.pipeline_mode<synchronous>, transform_indices = @transform_4, window_bounds = array<i64: 8, 128>}, {pipeline_mode = #tpu.pipeline_mode<synchronous>, transform_indices = @transform_5, window_bounds = array<i64: 1, 128>}, {transform_indices = @transform_6, window_bounds = array<i64: 2, 128>}]} {
    %c0 = arith.constant 0 : index
    %c0_0 = arith.constant 0 : index
    %0 = vector.load %arg1[%c0, %c0_0] : memref<4x1024xbf16, #tpu.memory_space<vmem>>, vector<4x1024xbf16>
    %1 = arith.extf %0 : vector<4x1024xbf16> to vector<4x1024xf32>
    %c0_1 = arith.constant 0 : index
    %c0_2 = arith.constant 0 : index
    %c0_3 = arith.constant 0 : index
    %2 = vector.load %arg3[%c0_1, %c0_2, %c0_3] : memref<9x8x4xbf16, #tpu.memory_space<vmem>>, vector<1x8x4xbf16>
    %3 = vector.shape_cast %2 : vector<1x8x4xbf16> to vector<8x4xbf16>
    %4 = arith.truncf %1 : vector<4x1024xf32> to vector<4x1024xbf16>
    %cst = arith.constant dense<0.000000e+00> : vector<8x1024xf32>
    %5 = tpu.matmul %3, %4, %cst {dimension_numbers = #tpu.dot_dimension_numbers<[1], [0], [0], [1], [0, 0, 1, 1], [], []>} : vector<8x4xbf16>, vector<4x1024xbf16>, vector<8x1024xf32> -> vector<8x1024xf32>
    %c1023_i32 = arith.constant 1023 : i32
    %6 = tpu.dynamic_rotate %1 by %c1023_i32 dim 1 : vector<4x1024xf32>, i32 -> vector<4x1024xf32>
    %c1 = arith.constant 1 : index
    %c0_4 = arith.constant 0 : index
    %c0_5 = arith.constant 0 : index
    %7 = vector.load %arg3[%c1, %c0_4, %c0_5] : memref<9x8x4xbf16, #tpu.memory_space<vmem>>, vector<1x8x4xbf16>
    %8 = vector.shape_cast %7 : vector<1x8x4xbf16> to vector<8x4xbf16>
    %9 = arith.truncf %6 : vector<4x1024xf32> to vector<4x1024xbf16>
    %cst_6 = arith.constant dense<0.000000e+00> : vector<8x1024xf32>
    %10 = tpu.matmul %8, %9, %cst_6 {dimension_numbers = #tpu.dot_dimension_numbers<[1], [0], [0], [1], [0, 0, 1, 1], [], []>} : vector<8x4xbf16>, vector<4x1024xbf16>, vector<8x1024xf32> -> vector<8x1024xf32>
    %11 = arith.addf %5, %10 : vector<8x1024xf32>
    %c1022_i32 = arith.constant 1022 : i32
    %12 = tpu.dynamic_rotate %1 by %c1022_i32 dim 1 : vector<4x1024xf32>, i32 -> vector<4x1024xf32>
    %c2 = arith.constant 2 : index
    %c0_7 = arith.constant 0 : index
    %c0_8 = arith.constant 0 : index
    %13 = vector.load %arg3[%c2, %c0_7, %c0_8] : memref<9x8x4xbf16, #tpu.memory_space<vmem>>, vector<1x8x4xbf16>
    %14 = vector.shape_cast %13 : vector<1x8x4xbf16> to vector<8x4xbf16>
    %15 = arith.truncf %12 : vector<4x1024xf32> to vector<4x1024xbf16>
    %cst_9 = arith.constant dense<0.000000e+00> : vector<8x1024xf32>
    %16 = tpu.matmul %14, %15, %cst_9 {dimension_numbers = #tpu.dot_dimension_numbers<[1], [0], [0], [1], [0, 0, 1, 1], [], []>} : vector<8x4xbf16>, vector<4x1024xbf16>, vector<8x1024xf32> -> vector<8x1024xf32>
    %17 = arith.addf %11, %16 : vector<8x1024xf32>
    %c1004_i32 = arith.constant 1004 : i32
    %18 = tpu.dynamic_rotate %1 by %c1004_i32 dim 1 : vector<4x1024xf32>, i32 -> vector<4x1024xf32>
    %c3 = arith.constant 3 : index
    %c0_10 = arith.constant 0 : index
    %c0_11 = arith.constant 0 : index
    %19 = vector.load %arg3[%c3, %c0_10, %c0_11] : memref<9x8x4xbf16, #tpu.memory_space<vmem>>, vector<1x8x4xbf16>
    %20 = vector.shape_cast %19 : vector<1x8x4xbf16> to vector<8x4xbf16>
    %21 = arith.truncf %18 : vector<4x1024xf32> to vector<4x1024xbf16>
    %cst_12 = arith.constant dense<0.000000e+00> : vector<8x1024xf32>
    %22 = tpu.matmul %20, %21, %cst_12 {dimension_numbers = #tpu.dot_dimension_numbers<[1], [0], [0], [1], [0, 0, 1, 1], [], []>} : vector<8x4xbf16>, vector<4x1024xbf16>, vector<8x1024xf32> -> vector<8x1024xf32>
    %23 = arith.addf %17, %22 : vector<8x1024xf32>
    %c1003_i32 = arith.constant 1003 : i32
    %24 = tpu.dynamic_rotate %1 by %c1003_i32 dim 1 : vector<4x1024xf32>, i32 -> vector<4x1024xf32>
    %c4 = arith.constant 4 : index
    %c0_13 = arith.constant 0 : index
    %c0_14 = arith.constant 0 : index
    %25 = vector.load %arg3[%c4, %c0_13, %c0_14] : memref<9x8x4xbf16, #tpu.memory_space<vmem>>, vector<1x8x4xbf16>
    %26 = vector.shape_cast %25 : vector<1x8x4xbf16> to vector<8x4xbf16>
    %27 = arith.truncf %24 : vector<4x1024xf32> to vector<4x1024xbf16>
    %cst_15 = arith.constant dense<0.000000e+00> : vector<8x1024xf32>
    %28 = tpu.matmul %26, %27, %cst_15 {dimension_numbers = #tpu.dot_dimension_numbers<[1], [0], [0], [1], [0, 0, 1, 1], [], []>} : vector<8x4xbf16>, vector<4x1024xbf16>, vector<8x1024xf32> -> vector<8x1024xf32>
    %29 = arith.addf %23, %28 : vector<8x1024xf32>
    %c1002_i32 = arith.constant 1002 : i32
    %30 = tpu.dynamic_rotate %1 by %c1002_i32 dim 1 : vector<4x1024xf32>, i32 -> vector<4x1024xf32>
    %c5 = arith.constant 5 : index
    %c0_16 = arith.constant 0 : index
    %c0_17 = arith.constant 0 : index
    %31 = vector.load %arg3[%c5, %c0_16, %c0_17] : memref<9x8x4xbf16, #tpu.memory_space<vmem>>, vector<1x8x4xbf16>
    %32 = vector.shape_cast %31 : vector<1x8x4xbf16> to vector<8x4xbf16>
    %33 = arith.truncf %30 : vector<4x1024xf32> to vector<4x1024xbf16>
    %cst_18 = arith.constant dense<0.000000e+00> : vector<8x1024xf32>
    %34 = tpu.matmul %32, %33, %cst_18 {dimension_numbers = #tpu.dot_dimension_numbers<[1], [0], [0], [1], [0, 0, 1, 1], [], []>} : vector<8x4xbf16>, vector<4x1024xbf16>, vector<8x1024xf32> -> vector<8x1024xf32>
    %35 = arith.addf %29, %34 : vector<8x1024xf32>
    %c984_i32 = arith.constant 984 : i32
    %36 = tpu.dynamic_rotate %1 by %c984_i32 dim 1 : vector<4x1024xf32>, i32 -> vector<4x1024xf32>
    %c6 = arith.constant 6 : index
    %c0_19 = arith.constant 0 : index
    %c0_20 = arith.constant 0 : index
    %37 = vector.load %arg3[%c6, %c0_19, %c0_20] : memref<9x8x4xbf16, #tpu.memory_space<vmem>>, vector<1x8x4xbf16>
    %38 = vector.shape_cast %37 : vector<1x8x4xbf16> to vector<8x4xbf16>
    %39 = arith.truncf %36 : vector<4x1024xf32> to vector<4x1024xbf16>
    %cst_21 = arith.constant dense<0.000000e+00> : vector<8x1024xf32>
    %40 = tpu.matmul %38, %39, %cst_21 {dimension_numbers = #tpu.dot_dimension_numbers<[1], [0], [0], [1], [0, 0, 1, 1], [], []>} : vector<8x4xbf16>, vector<4x1024xbf16>, vector<8x1024xf32> -> vector<8x1024xf32>
    %41 = arith.addf %35, %40 : vector<8x1024xf32>
    %c983_i32 = arith.constant 983 : i32
    %42 = tpu.dynamic_rotate %1 by %c983_i32 dim 1 : vector<4x1024xf32>, i32 -> vector<4x1024xf32>
    %c7 = arith.constant 7 : index
    %c0_22 = arith.constant 0 : index
    %c0_23 = arith.constant 0 : index
    %43 = vector.load %arg3[%c7, %c0_22, %c0_23] : memref<9x8x4xbf16, #tpu.memory_space<vmem>>, vector<1x8x4xbf16>
    %44 = vector.shape_cast %43 : vector<1x8x4xbf16> to vector<8x4xbf16>
    %45 = arith.truncf %42 : vector<4x1024xf32> to vector<4x1024xbf16>
    %cst_24 = arith.constant dense<0.000000e+00> : vector<8x1024xf32>
    %46 = tpu.matmul %44, %45, %cst_24 {dimension_numbers = #tpu.dot_dimension_numbers<[1], [0], [0], [1], [0, 0, 1, 1], [], []>} : vector<8x4xbf16>, vector<4x1024xbf16>, vector<8x1024xf32> -> vector<8x1024xf32>
    %47 = arith.addf %41, %46 : vector<8x1024xf32>
    %c982_i32 = arith.constant 982 : i32
    %48 = tpu.dynamic_rotate %1 by %c982_i32 dim 1 : vector<4x1024xf32>, i32 -> vector<4x1024xf32>
    %c8 = arith.constant 8 : index
    %c0_25 = arith.constant 0 : index
    %c0_26 = arith.constant 0 : index
    %49 = vector.load %arg3[%c8, %c0_25, %c0_26] : memref<9x8x4xbf16, #tpu.memory_space<vmem>>, vector<1x8x4xbf16>
    %50 = vector.shape_cast %49 : vector<1x8x4xbf16> to vector<8x4xbf16>
    %51 = arith.truncf %48 : vector<4x1024xf32> to vector<4x1024xbf16>
    %cst_27 = arith.constant dense<0.000000e+00> : vector<8x1024xf32>
    %52 = tpu.matmul %50, %51, %cst_27 {dimension_numbers = #tpu.dot_dimension_numbers<[1], [0], [0], [1], [0, 0, 1, 1], [], []>} : vector<8x4xbf16>, vector<4x1024xbf16>, vector<8x1024xf32> -> vector<8x1024xf32>
    %53 = arith.addf %47, %52 : vector<8x1024xf32>
    %c0_28 = arith.constant 0 : index
    %c0_29 = arith.constant 0 : index
    %54 = vector.load %arg4[%c0_28, %c0_29] : memref<8x1xf32, #tpu.memory_space<vmem>>, vector<8x1xf32>
    %55 = vector.broadcast %54 : vector<8x1xf32> to vector<8x1024xf32>
    %56 = arith.addf %53, %55 : vector<8x1024xf32>
    %cst_30 = arith.constant 0.000000e+00 : f32
    %57 = vector.broadcast %cst_30 : f32 to vector<8x1024xf32>
    %58 = arith.maximumf %56, %57 : vector<8x1024xf32>
    %c0_31 = arith.constant 0 : index
    %c0_32 = arith.constant 0 : index
    %59 = vector.load %arg2[%c0_31, %c0_32] : memref<2x1024xbf16, #tpu.memory_space<vmem>>, vector<2x1024xbf16>
    %60 = arith.truncf %58 : vector<8x1024xf32> to vector<8x1024xbf16>
    %cst_33 = arith.constant dense<0.000000e+00> : vector<2x8xf32>
    %61 = tpu.matmul %59, %60, %cst_33 {dimension_numbers = #tpu.dot_dimension_numbers<[1], [1], [0], [0], [0, 0, 1, 0], [], []>} : vector<2x1024xbf16>, vector<8x1024xbf16>, vector<2x8xf32> -> vector<2x8xf32>
    %62 = arith.truncf %61 : vector<2x8xf32> to vector<2x8xbf16>
    %c0_34 = arith.constant 0 : index
    %c0_35 = arith.constant 0 : index
    %63 = vector.load %arg5[%c0_34, %c0_35] : memref<8x128xbf16, #tpu.memory_space<vmem>>, vector<8x128xbf16>
    %cst_36 = arith.constant dense<0.000000e+00> : vector<2x128xf32>
    %64 = tpu.matmul %62, %63, %cst_36 {dimension_numbers = #tpu.dot_dimension_numbers<[1], [0], [0], [1], [0, 0, 1, 1], [], []>} : vector<2x8xbf16>, vector<8x128xbf16>, vector<2x128xf32> -> vector<2x128xf32>
    %c0_37 = arith.constant 0 : index
    %c0_38 = arith.constant 0 : index
    %65 = vector.load %arg6[%c0_37, %c0_38] : memref<1x128xf32, #tpu.memory_space<vmem>>, vector<1x128xf32>
    %66 = vector.broadcast %65 : vector<1x128xf32> to vector<2x128xf32>
    %67 = arith.addf %64, %66 : vector<2x128xf32>
    %c0_39 = arith.constant 0 : index
    %c0_40 = arith.constant 0 : index
    %68 = vector.load %arg7[%c0_39, %c0_40] : memref<2x128xf32, #tpu.memory_space<vmem>>, vector<2x128xf32>
    tpu.vector_store %arg7[%c0_39, %c0_40], %67 {strides = array<i32>} : memref<2x128xf32, #tpu.memory_space<vmem>>, vector<2x128xf32>,
    return
  }
  func.func @transform_0(%arg0: i32) -> (i32, i32) {
    %c0_i32 = arith.constant 0 : i32
    %c0_i32_0 = arith.constant 0 : i32
    return %c0_i32, %arg0 : i32, i32
  }
  func.func @transform_1(%arg0: i32) -> (i32, i32) {
    %c0_i32 = arith.constant 0 : i32
    %c0_i32_0 = arith.constant 0 : i32
    %c0_i32_1 = arith.constant 0 : i32
    return %c0_i32, %c0_i32_0 : i32, i32
  }
  func.func @transform_2(%arg0: i32) -> (i32, i32, i32) {
    %c0_i32 = arith.constant 0 : i32
    %c0_i32_0 = arith.constant 0 : i32
    %c0_i32_1 = arith.constant 0 : i32
    %c0_i32_2 = arith.constant 0 : i32
    return %c0_i32, %c0_i32_0, %c0_i32_1 : i32, i32, i32
  }
  func.func @transform_3(%arg0: i32) -> (i32, i32) {
    %c0_i32 = arith.constant 0 : i32
    %c0_i32_0 = arith.constant 0 : i32
    %c0_i32_1 = arith.constant 0 : i32
    return %c0_i32, %c0_i32_0 : i32, i32
  }
  func.func @transform_4(%arg0: i32) -> (i32, i32) {
    %c0_i32 = arith.constant 0 : i32
    %c0_i32_0 = arith.constant 0 : i32
    %c0_i32_1 = arith.constant 0 : i32
    return %c0_i32, %c0_i32_0 : i32, i32
  }
  func.func @transform_5(%arg0: i32) -> (i32, i32) {
    %c0_i32 = arith.constant 0 : i32
    %c0_i32_0 = arith.constant 0 : i32
    %c0_i32_1 = arith.constant 0 : i32
    return %c0_i32, %c0_i32_0 : i32, i32
  }
  func.func @transform_6(%arg0: i32) -> (i32, i32) {
    %c0_i32 = arith.constant 0 : i32
    %c0_i32_0 = arith.constant 0 : i32
    return %arg0, %c0_i32 : i32, i32
  }
}

</mosaic_0001>

<bundles_post_ra>
// kernel: _forward.1
= control target key start
LH: loop header
LB: loop body
LE: loop exit
PB: predicated region body
PF: predicated region fallthrough
CT: control target
= control target key end

     0   :  { %s2766_s0 = inlined_call_operand.vmem [shape: bf16[4,1024], index: 0, kind: input, shape index: {}]   ;;  %s2767_s1 = inlined_call_operand.vmem [shape: bf16[2,1024], index: 1, kind: input, shape index: {}]   ;;  %s2768_s2 = inlined_call_operand.vmem [shape: bf16[9,8,4], index: 2, kind: input, shape index: {}]   ;;  %s2769_s3 = inlined_call_operand.vmem [shape: f32[8,1], index: 3, kind: input, shape index: {}]   ;;  %s2770_s4 = inlined_call_operand.vmem [shape: bf16[8,128], index: 4, kind: input, shape index: {}]   ;;  %s2771_s5 = inlined_call_operand.vmem [shape: f32[1,128], index: 5, kind: input, shape index: {}]   ;;  %s2772_s6 = inlined_call_operand.hbm [shape: f32[2,128], index: 6, kind: output, shape index: {}]  }
   0x1   :  { %v25_v0 = vld [vmem:[%s2766_s0] sm:$0xff]  ;;  %v26_v1 = vld [vmem:[%s2766_s0 + $0x8] sm:$0xff] }
   0x2   :  { %v2232_v2 = vunpack.c.h.bf16 %v25_v0  ;;  %v2234_v3 = vunpack.c.l.bf16 %v25_v0  ;;  %v2236_v4 = vunpack.c.l.bf16 %v26_v1 }
   0x3   :  { %11 = vsyncpa [#allocation3], 0  ;;  %v2238_v5 = vunpack.c.h.bf16 %v26_v1  ;;  %s2181_s0 = smov 127   ;;  %s2182_s25 = smov 126   ;;  %v75_v55 = vlaneseq  ;;  %vm100_vm1 = vcmask 1041408   ;;  %vm96_vm2 = vcmask 31744  }
   0x4   :  { %38 = vst [vmem:[#allocation1 + $0x10] ss:$2 sm:$0xff] %v2232_v2  ;;  %s2183_s26 = smov 108   ;;  %s2184_s27 = smov 107   ;;  %vm1907_vm10 = vcmask 1043456   ;;  %vm1903_vm11 = vcmask 64512  }
   0x5   :  { %36 = vst [vmem:[#allocation1] ss:$2 sm:$0xff] %v2234_v3  ;;  %v2275_v56 = vand.u32 127, %v75_v55  ;;  %s2185_s30 = smov 106   ;;  %s2186_s9 = smov 88  }
   0x6   :  { %40 = vst [vmem:[#allocation1 + $0x20] ss:$2 sm:$0xff] %v2236_v4  ;;  %s2187_s12 = smov 87   ;;  %s2188_s15 = smov 86  }
   0x7   :  { %42 = vst [vmem:[#allocation1 + $0x30] ss:$2 sm:$0xff] %v2238_v5  ;;  %vm77_vm0 = vcmp.lt.s32.totalorder %v2275_v56, 127  ;;  %vm404_vm3 = vcmp.lt.s32.totalorder %v2275_v56, 126  ;;  %vm601_vm4 = vcmp.lt.s32.totalorder %v2275_v56, 108  ;;  %vm798_vm5 = vcmp.lt.s32.totalorder %v2275_v56, 107 }
   0x8   :  { %vm995_vm6 = vcmp.lt.s32.totalorder %v2275_v56, 106  ;;  %vm1192_vm7 = vcmp.lt.s32.totalorder %v2275_v56, 88  ;;  %vm1389_vm8 = vcmp.lt.s32.totalorder %v2275_v56, 87  ;;  %vm1586_vm9 = vcmp.lt.s32.totalorder %v2275_v56, 86  ;;  %s2190_s29 = smov [#allocation2]  }
   0xb   :  { %v45_v6 = vld.sshfl [vmem:[#allocation1 + $0x10] sm:$0xff pattern:$0x75316420]  ;;  %v46_v7 = vld.sshfl [vmem:[#allocation1 + $0x18] sm:$0xff pattern:$0x75316420] }
   0xc   :  { %v2032_v8 = vpack.i.bf16 %v46_v7, %v45_v6  ;;  %v43_v9 = vld.sshfl [vmem:[#allocation1] sm:$0xff pattern:$0x75316420]  ;;  %v44_v10 = vld.sshfl [vmem:[#allocation1 + $0x8] sm:$0xff pattern:$0x75316420] }
   0xd   :  { %v2037_v11 = vpack.i.bf16 %v44_v10, %v43_v9  ;;  %230 = vst [vmem:[#allocation1] ss:$4 sm:$0xff] %v25_v0  ;;  %v47_v12 = vld.sshfl [vmem:[#allocation1 + $0x20] sm:$0xff pattern:$0x75316420] }
   0xe   :  { %2033 = vrot.lane.b32.xlu0 %v2032_v8, %s2181_s0  ;;  %v49_v13 = vld.sshfl [vmem:[#allocation1 + $0x30] sm:$0xff pattern:$0x75316420]  ;;  %v50_v14 = vld.sshfl [vmem:[#allocation1 + $0x38] sm:$0xff pattern:$0x75316420] }
   0xf   :  { %2038 = vrot.lane.b32.xlu1 %v2037_v11, %s2181_s0  ;;  %v48_v15 = vld.sshfl [vmem:[#allocation1 + $0x28] sm:$0xff pattern:$0x75316420]  ;;  %v2042_v16 = vpack.i.bf16 %v50_v14, %v49_v13 }
  0x10   :  { %69 = vrot.lane.b32.xlu2 %v48_v15, %s2181_s0  ;;  %233 = vst [vmem:[#allocation1 + $0x20] ss:$4 sm:$0xff] %v26_v1 }
  0x14   :  { %v2244_v17 = vld.sshfl [vmem:[#allocation1] sm:$0xff pattern:$0x73625140]  ;;  %v2246_v18 = vld.sshfl [vmem:[#allocation1 + $0x8] sm:$0xff pattern:$0x73625140] }
  0x15   :  { %365 = vst [vmem:[#allocation1] ss:$2 sm:$0xff] %v2234_v3  ;;  %v2249_v19 = vld.sshfl [vmem:[#allocation1 + $0x10] sm:$0xff pattern:$0x73625140] }
  0x16   :  { %67 = vrot.lane.b32.xlu0 %v47_v12, %s2181_s0  ;;  %v2251_v20 = vld.sshfl [vmem:[#allocation1 + $0x18] sm:$0xff pattern:$0x73625140] }
  0x17   :  { %2043 = vrot.lane.b32.xlu1 %v2042_v16, %s2181_s0  ;;  %v2253_v21 = vld.sshfl [vmem:[#allocation1 + $0x20] sm:$0xff pattern:$0x73625140]  ;;  %v2255_v22 = vld.sshfl [vmem:[#allocation1 + $0x28] sm:$0xff pattern:$0x73625140] }
  0x18   :  { %369 = vst [vmem:[#allocation1 + $0x20] ss:$2 sm:$0xff] %v2236_v4  ;;  %v2258_v23 = vld.sshfl [vmem:[#allocation1 + $0x30] sm:$0xff pattern:$0x73625140] }
  0x19   :  { %367 = vst [vmem:[#allocation1 + $0x10] ss:$2 sm:$0xff] %v2232_v2  ;;  %v2261_v24 = vld.sshfl [vmem:[#allocation1 + $0x38] sm:$0xff pattern:$0x73625140] }
  0x1a   :  { %371 = vst [vmem:[#allocation1 + $0x30] ss:$2 sm:$0xff] %v2238_v5  ;;  %v1941_v16 = vld [vmem:[%s2768_s2 + $0x4] sm:$0xf] }
  0x1c   :  { %v372_v25 = vld.sshfl [vmem:[#allocation1] sm:$0xff pattern:$0x75316420]  ;;  %v373_v26 = vld.sshfl [vmem:[#allocation1 + $0x8] sm:$0xff pattern:$0x75316420] }
  0x1d   :  { %v2052_v27 = vpack.i.bf16 %v373_v26, %v372_v25  ;;  %562 = vst [vmem:[#allocation1] ss:$2 sm:$0xff] %v2234_v3 }
  0x1f   :  { %v376_v28 = vld.sshfl [vmem:[#allocation1 + $0x20] sm:$0xff pattern:$0x75316420]  ;;  %2053 = vrot.lane.b32.xlu1 %v2052_v27, %s2182_s25  ;;  %v377_v29 = vld.sshfl [vmem:[#allocation1 + $0x28] sm:$0xff pattern:$0x75316420] }
  0x20   :  { %396 = vrot.lane.b32.xlu0 %v376_v28, %s2182_s25  ;;  %566 = vst [vmem:[#allocation1 + $0x20] ss:$2 sm:$0xff] %v2236_v4  ;;  %v374_v30 = vld.sshfl [vmem:[#allocation1 + $0x10] sm:$0xff pattern:$0x75316420] }
  0x21   :  { %v375_v31 = vld.sshfl [vmem:[#allocation1 + $0x18] sm:$0xff pattern:$0x75316420]  ;;  %v378_v32 = vld.sshfl [vmem:[#allocation1 + $0x30] sm:$0xff pattern:$0x75316420] }
  0x22   :  { %v2047_v33 = vpack.i.bf16 %v375_v31, %v374_v30  ;;  %564 = vst [vmem:[#allocation1 + $0x10] ss:$2 sm:$0xff] %v2232_v2  ;;  %v379_v34 = vld.sshfl [vmem:[#allocation1 + $0x38] sm:$0xff pattern:$0x75316420] }
  0x23   :  { %568 = vst [vmem:[#allocation1 + $0x30] ss:$2 sm:$0xff] %v2238_v5  ;;  %v2057_v37 = vpack.i.bf16 %v379_v34, %v378_v32 }
  0x24   :  { %2048 = vrot.lane.b32.xlu2 %v2047_v33, %s2182_s25  ;;  %v569_v35 = vld.sshfl [vmem:[#allocation1] sm:$0xff pattern:$0x75316420]  ;;  %v570_v36 = vld.sshfl [vmem:[#allocation1 + $0x8] sm:$0xff pattern:$0x75316420] }
  0x25   :  { %759 = vst [vmem:[#allocation1] ss:$2 sm:$0xff] %v2234_v3  ;;  %v2067_v43 = vpack.i.bf16 %v570_v36, %v569_v35 }
  0x27   :  { %v573_v45 = vld.sshfl [vmem:[#allocation1 + $0x20] sm:$0xff pattern:$0x75316420]  ;;  %v574_v46 = vld.sshfl [vmem:[#allocation1 + $0x28] sm:$0xff pattern:$0x75316420] }
  0x28   :  { %398 = vrot.lane.b32.xlu0 %v377_v29, %s2182_s25  ;;  %763 = vst [vmem:[#allocation1 + $0x20] ss:$2 sm:$0xff] %v2236_v4  ;;  %v245_v29 = vsel %vm100_vm1, %v2244_v17, 0 }
  0x29   :  { %v571_v38 = vld.sshfl [vmem:[#allocation1 + $0x10] sm:$0xff pattern:$0x75316420]  ;;  %v572_v39 = vld.sshfl [vmem:[#allocation1 + $0x18] sm:$0xff pattern:$0x75316420] }
  0x2a   :  { %v2062_v40 = vpack.i.bf16 %v572_v39, %v571_v38  ;;  %761 = vst [vmem:[#allocation1 + $0x10] ss:$2 sm:$0xff] %v2232_v2  ;;  %v575_v41 = vld.sshfl [vmem:[#allocation1 + $0x30] sm:$0xff pattern:$0x75316420] }
  0x2b   :  { %v576_v42 = vld.sshfl [vmem:[#allocation1 + $0x38] sm:$0xff pattern:$0x75316420] }
  0x2c   :  { %2058 = vrot.lane.b32.xlu2 %v2057_v37, %s2182_s25  ;;  %2063 = vrot.lane.b32.xlu1 %v2062_v40, %s2183_s26  ;;  %765 = vst [vmem:[#allocation1 + $0x30] ss:$2 sm:$0xff] %v2238_v5  ;;  %v2072_v44 = vpack.i.bf16 %v576_v42, %v575_v41  ;;  %v766_v61 = vld.sshfl [vmem:[#allocation1] sm:$0xff pattern:$0x75316420] }
  0x2d   :  { %v767_v62 = vld.sshfl [vmem:[#allocation1 + $0x8] sm:$0xff pattern:$0x75316420] }
  0x2e   :  { %v2082_v1 = vpack.i.bf16 %v767_v62, %v766_v61  ;;  %956 = vst [vmem:[#allocation1] ss:$2 sm:$0xff] %v2234_v3 }
  0x2f   :  { %v770_v50 = vld.sshfl [vmem:[#allocation1 + $0x20] sm:$0xff pattern:$0x75316420]  ;;  %v771_v51 = vld.sshfl [vmem:[#allocation1 + $0x28] sm:$0xff pattern:$0x75316420] }
  0x30   :  { %2068 = vrot.lane.b32.xlu0 %v2067_v43, %s2183_s26  ;;  %960 = vst [vmem:[#allocation1 + $0x20] ss:$2 sm:$0xff] %v2236_v4 }
  0x31   :  { %v768_v47 = vld.sshfl [vmem:[#allocation1 + $0x10] sm:$0xff pattern:$0x75316420]  ;;  %v769_v48 = vld.sshfl [vmem:[#allocation1 + $0x18] sm:$0xff pattern:$0x75316420] }
  0x32   :  { %v2077_v49 = vpack.i.bf16 %v769_v48, %v768_v47  ;;  %958 = vst [vmem:[#allocation1 + $0x10] ss:$2 sm:$0xff] %v2232_v2  ;;  %v249_v47 = vsel %vm100_vm1, %v2249_v19, 0  ;;  %v255_v19 = vsel %vm100_vm1, %v2255_v22, 0 }
  0x33   :  { %v772_v52 = vld.sshfl [vmem:[#allocation1 + $0x30] sm:$0xff pattern:$0x75316420]  ;;  %v773_v53 = vld.sshfl [vmem:[#allocation1 + $0x38] sm:$0xff pattern:$0x75316420] }
  0x34   :  { %2073 = vrot.lane.b32.xlu1 %v2072_v44, %s2183_s26  ;;  %593 = vrot.lane.b32.xlu2 %v573_v45, %s2183_s26  ;;  %v2087_v54 = vpack.i.bf16 %v773_v53, %v772_v52  ;;  %962 = vst [vmem:[#allocation1 + $0x30] ss:$2 sm:$0xff] %v2238_v5  ;;  %v247_v44 = vsel %vm100_vm1, %v2246_v18, 0  ;;  %v253_v18 = vsel %vm100_vm1, %v2253_v21, 0  ;;  %v259_v52 = vsel %vm100_vm1, %v2261_v24, 0 }
  0x35   :  { %v963_v35 = vld.sshfl [vmem:[#allocation1] sm:$0xff pattern:$0x75316420]  ;;  %v964_v39 = vld.sshfl [vmem:[#allocation1 + $0x8] sm:$0xff pattern:$0x75316420] }
  0x36   :  { %1153 = vst [vmem:[#allocation1] ss:$2 sm:$0xff] %v2234_v3  ;;  %v2097_v48 = vpack.i.bf16 %v964_v39, %v963_v35 }
  0x37   :  { %v967_v34 = vld.sshfl [vmem:[#allocation1 + $0x20] sm:$0xff pattern:$0x75316420] }
  0x38   :  { %2078 = vrot.lane.b32.xlu0 %v2077_v49, %s2184_s27 }
  0x39   :  { %v965_v22 = vld.sshfl [vmem:[#allocation1 + $0x10] sm:$0xff pattern:$0x75316420] }
  0x3c   :  { %595 = vrot.lane.b32.xlu2 %v574_v46, %s2183_s26  ;;  %790 = vrot.lane.b32.xlu1 %v770_v50, %s2184_s27  ;;  %v251_v50 = vsel %vm100_vm1, %v2251_v20, 0  ;;  %v257_v20 = vsel %vm100_vm1, %v2258_v23, 0 }
  0x40   :  { %2088 = vrot.lane.b32.xlu0 %v2087_v54, %s2184_s27 }
  0x44   :  { %792 = vrot.lane.b32.xlu1 %v771_v51, %s2184_s27  ;;  %2083 = vrot.lane.b32.xlu2 %v2082_v1, %s2184_s27  ;;  %v968_v51 = vld.sshfl [vmem:[#allocation1 + $0x28] sm:$0xff pattern:$0x75316420] }
  0x45   :  { %1157 = vst [vmem:[#allocation1 + $0x20] ss:$2 sm:$0xff] %v2236_v4 }
  0x48   :  { %987 = vrot.lane.b32.xlu0 %v967_v34, %s2185_s30 }
  0x4c   :  { %2098 = vrot.lane.b32.xlu1 %v2097_v48, %s2185_s30 }
  0x50   :  { %989 = vrot.lane.b32.xlu0 %v968_v51, %s2185_s30 }
  0x6a   :  { %v70_v13 = vpop.permute.xlu2 %69 }
  0x7e   :  { %v2049_v21 = vpop.permute.xlu2 %2048 }
  0x7f   :  { %v2051_v23 = vunpack.i.h.bf16 %v2049_v21  ;;  %v2050_v54 = vunpack.i.l.bf16 %v2049_v21 }
  0x80   :  { %v2034_v57 = vpop.permute.xlu0 %2033 }
  0x81   :  { %v2036_v58 = vunpack.i.h.bf16 %v2034_v57  ;;  %v2035_v59 = vunpack.i.l.bf16 %v2034_v57  ;;  %v2039_v60 = vpop.permute.xlu1 %2038  ;;  %v409_v61 = vsel %vm404_vm3, %v2050_v54, %v2051_v23 }
  0x82   :  { %v2041_v63 = vunpack.i.h.bf16 %v2039_v60  ;;  %v2040_v0 = vunpack.i.l.bf16 %v2039_v60  ;;  %v417_v1 = vpack.c.bf16 %v409_v61, %v409_v61 }
  0x83   :  { %v82_v6 = vsel %vm77_vm0, %v2035_v59, %v2036_v58 }
  0x84   :  { %v84_v7 = vsel %vm77_vm0, %v2040_v0, %v2041_v63  ;;  %v83_v8 = vsel %vm77_vm0, %v2041_v63, %v2035_v59  ;;  %v90_v9 = vpack.c.bf16 %v82_v6, %v82_v6  ;;  %v31_v6 = vld [vmem:[%s2768_s2] sm:$0xf] }
  0x85   :  { %v88_v10 = vpack.c.bf16 %v84_v7, %v84_v7  ;;  %v89_v11 = vpack.c.bf16 %v83_v8, %v83_v8 }
  0x86   :  { %v108_v12 = vsel %vm100_vm1, %v90_v9, 0 }
  0x87   :  { %v102_v14 = vsel %vm100_vm1, %v88_v10, 0  ;;  %v105_v15 = vsel %vm100_vm1, %v89_v11, 0  ;;  %158 = vmatpush.bf16.msra.mxu2 %v108_v12  ;;  %v433_v10 = vsel %vm100_vm1, %v417_v1, 0  ;;  %v969_v12 = vld.sshfl [vmem:[#allocation1 + $0x30] sm:$0xff pattern:$0x75316420] }
  0x88   :  { %132 = vmatpush.bf16.msra.mxu0 %v102_v14  ;;  %145 = vmatpush.bf16.msra.mxu1 %v105_v15  ;;  %v68_v25 = vpop.permute.xlu0 %67 }
  0x89   :  { %v80_v26 = vsel %vm77_vm0, %v68_v25, %v70_v13  ;;  %v81_v27 = vsel %vm77_vm0, %v2036_v58, %v68_v25  ;;  %v2044_v28 = vpop.permute.xlu1 %2043  ;;  %v966_v58 = vld.sshfl [vmem:[#allocation1 + $0x18] sm:$0xff pattern:$0x75316420] }
  0x8a   :  { %v92_v30 = vpack.c.bf16 %v80_v26, %v80_v26  ;;  %v2046_v31 = vunpack.i.h.bf16 %v2044_v28  ;;  %v2045_v32 = vunpack.i.l.bf16 %v2044_v28  ;;  %1944 = vmatmul.msk.bf16.vlgmr.msra.gmra.mxu2 %vm96_vm2, %v1941_v16  ;;  %v91_v33 = vpack.c.bf16 %v81_v27, %v81_v27  ;;  %1155 = vst [vmem:[#allocation1 + $0x10] ss:$2 sm:$0xff] %v2232_v2  ;;  %v1160_v26 = vld.sshfl [vmem:[#allocation1] sm:$0xff pattern:$0x75316420] }
  0x8b   :  { %1942 = vmatmul.msk.bf16.vlgmr.msra.gmra.mxu0 %vm96_vm2, %v1941_v16  ;;  %1943 = vmatmul.msk.bf16.vlgmr.msra.gmra.mxu1 %vm96_vm2, %v1941_v16  ;;  %v2092_v59 = vpack.i.bf16 %v966_v58, %v965_v22  ;;  %v1958_v58 = vld [vmem:[%s2768_s2 + $0x8] sm:$0xf] }
  0x8c   :  { %v111_v36 = vsel %vm100_vm1, %v91_v33, 0  ;;  %v114_v37 = vsel %vm100_vm1, %v92_v30, 0  ;;  %v85_v38 = vsel %vm77_vm0, %v2046_v31, %v2040_v0  ;;  %v79_v17 = vsel %vm77_vm0, %v70_v13, %v2045_v32  ;;  %v970_v13 = vld.sshfl [vmem:[#allocation1 + $0x38] sm:$0xff pattern:$0x75316420] }
  0x8d   :  { %171 = vmatpush.bf16.msra.mxu3 %v111_v36  ;;  %184 = vmatpush.bf16.msrb.mxu0 %v114_v37  ;;  %v95_v40 = vpack.c.bf16 %v85_v38, %v85_v38  ;;  %v93_v41 = vpack.c.bf16 %v79_v17, %v79_v17  ;;  %v78_v42 = vsel %vm77_vm0, %v2045_v32, %v2046_v31 }
  0x8e   :  { %v94_v43 = vpack.c.bf16 %v78_v42, %v78_v42  ;;  %2093 = vrot.lane.b32.xlu2 %v2092_v59, %s2185_s30  ;;  %v2102_v14 = vpack.i.bf16 %v970_v13, %v969_v12  ;;  %1159 = vst [vmem:[#allocation1 + $0x30] ss:$2 sm:$0xff] %v2238_v5 }
  0x8f   :  { %v123_v45 = vsel %vm100_vm1, %v95_v40, 0  ;;  %v117_v46 = vsel %vm100_vm1, %v93_v41, 0 }
  0x90   :  { %197 = vmatpush.bf16.msrb.mxu1 %v117_v46  ;;  %v120_v49 = vsel %vm100_vm1, %v94_v43, 0  ;;  %1945 = vmatmul.msk.bf16.vlgmr.msra.gmra.mxu3 %vm96_vm2, %v1941_v16 }
  0x91   :  { %268 = vmatpush.bf16.msra.mxu0 %v245_v29  ;;  %223 = vmatpush.bf16.msrb.mxu3 %v123_v45  ;;  %v2335_v53 = vpop.permute.xlu1 %2053  ;;  %v1162_v15 = vld.sshfl [vmem:[#allocation1 + $0x10] sm:$0xff pattern:$0x75316420]  ;;  %v1163_v25 = vld.sshfl [vmem:[#allocation1 + $0x18] sm:$0xff pattern:$0x75316420] }
  0x92   :  { %210 = vmatpush.bf16.msrb.mxu2 %v120_v49  ;;  %v2056_v55 = vunpack.i.h.bf16 %v2335_v53  ;;  %v2055_v57 = vunpack.i.l.bf16 %v2335_v53  ;;  %v397_v62 = vpop.permute.xlu0 %396  ;;  %v2107_v28 = vpack.i.bf16 %v1163_v25, %v1162_v15  ;;  %1352 = vst [vmem:[#allocation1 + $0x10] ss:$2 sm:$0xff] %v2232_v2  ;;  %v1161_v29 = vld.sshfl [vmem:[#allocation1 + $0x8] sm:$0xff pattern:$0x75316420] }
  0x93   :  { %v408_v7 = vsel %vm404_vm3, %v2051_v23, %v397_v62  ;;  %v2112_v32 = vpack.i.bf16 %v1161_v29, %v1160_v26  ;;  %1350 = vst [vmem:[#allocation1] ss:$2 sm:$0xff] %v2234_v3 }
  0x94   :  { %281 = vmatpush.bf16.msra.mxu1 %v247_v44  ;;  %v411_v24 = vsel %vm404_vm3, %v2055_v57, %v2056_v55  ;;  %v410_v60 = vsel %vm404_vm3, %v2056_v55, %v2050_v54  ;;  %v418_v11 = vpack.c.bf16 %v408_v7, %v408_v7  ;;  %2108 = vrot.lane.b32.xlu1 %v2107_v28, %s2186_s9 }
  0x95   :  { %307 = vmatpush.bf16.msra.mxu3 %v251_v50  ;;  %v415_v63 = vpack.c.bf16 %v411_v24, %v411_v24  ;;  %v416_v0 = vpack.c.bf16 %v410_v60, %v410_v60  ;;  %2113 = vrot.lane.b32.xlu0 %v2112_v32, %s2186_s9  ;;  %v1166_v36 = vld.sshfl [vmem:[#allocation1 + $0x30] sm:$0xff pattern:$0x75316420]  ;;  %v1167_v37 = vld.sshfl [vmem:[#allocation1 + $0x38] sm:$0xff pattern:$0x75316420] }
  0x96   :  { %294 = vmatpush.bf16.msra.mxu2 %v249_v47  ;;  %2103 = vrot.lane.b32.xlu2 %v2102_v14, %s2185_s30  ;;  %v436_v31 = vsel %vm100_vm1, %v418_v11, 0  ;;  %v2117_v17 = vpack.i.bf16 %v1167_v37, %v1166_v36  ;;  %1356 = vst [vmem:[#allocation1 + $0x30] ss:$2 sm:$0xff] %v2238_v5  ;;  %s1930_s30 = sshll.u32 %s2190_s29, 4  ;;  %s1931_s30 = int_to_ptr.vmem [resolvable:$true] %s1930_s30 }
  0x97   :  { %v427_v8 = vsel %vm100_vm1, %v415_v63, 0  ;;  %v430_v9 = vsel %vm100_vm1, %v416_v0, 0 }
  0x99   :  { %v1359_v63 = vld.sshfl [vmem:[#allocation1 + $0x10] sm:$0xff pattern:$0x75316420]  ;;  %v1360_v0 = vld.sshfl [vmem:[#allocation1 + $0x18] sm:$0xff pattern:$0x75316420] }
  0x9a   :  { %1948 = vmatmul.msk.bf16.vlgmr.msrb.gmra.mxu2 %vm96_vm2, %v1941_v16  ;;  %v399_v30 = vpop.permute.xlu0 %398  ;;  %v2122_v1 = vpack.i.bf16 %v1360_v0, %v1359_v63  ;;  %1549 = vst [vmem:[#allocation1 + $0x10] ss:$2 sm:$0xff] %v2232_v2 }
  0x9b   :  { %1946 = vmatmul.msk.bf16.vlgmr.msrb.gmra.mxu0 %vm96_vm2, %v1941_v16  ;;  %1947 = vmatmul.msk.bf16.vlgmr.msrb.gmra.mxu1 %vm96_vm2, %v1941_v16  ;;  %v407_v34 = vsel %vm404_vm3, %v397_v62, %v399_v30 }
  0x9c   :  { %320 = vmatpush.bf16.msrb.mxu0 %v253_v18  ;;  %333 = vmatpush.bf16.msrb.mxu1 %v255_v19  ;;  %v419_v39 = vpack.c.bf16 %v407_v34, %v407_v34  ;;  %v1164_v18 = vld.sshfl [vmem:[#allocation1 + $0x20] sm:$0xff pattern:$0x75316420] }
  0x9d   :  { %346 = vmatpush.bf16.msrb.mxu2 %v257_v20  ;;  %2118 = vrot.lane.b32.xlu1 %v2117_v17, %s2186_s9  ;;  %v1363_v13 = vld.sshfl [vmem:[#allocation1 + $0x30] sm:$0xff pattern:$0x75316420]  ;;  %v1364_v14 = vld.sshfl [vmem:[#allocation1 + $0x38] sm:$0xff pattern:$0x75316420] }
  0x9e   :  { %v439_v43 = vsel %vm100_vm1, %v419_v39, 0  ;;  %v2064_v47 = vpop.permute.xlu1 %2063  ;;  %1184 = vrot.lane.b32.xlu2 %v1164_v18, %s2186_s9  ;;  %2123 = vrot.lane.b32.xlu0 %v2122_v1, %s2187_s12  ;;  %1553 = vst [vmem:[#allocation1 + $0x30] ss:$2 sm:$0xff] %v2238_v5  ;;  %v1357_v34 = vld.sshfl [vmem:[#allocation1] sm:$0xff pattern:$0x75316420] }
  0x9f   :  { %v2066_v49 = vunpack.i.h.bf16 %v2064_v47  ;;  %v2065_v50 = vunpack.i.l.bf16 %v2064_v47 }
  0xa0   :  { %1949 = vmatmul.msk.bf16.vlgmr.msrb.gmra.mxu3 %vm96_vm2, %v1941_v16  ;;  %v2059_v16 = vpop.permute.xlu2 %2058 }
  0xa1   :  { %359 = vmatpush.bf16.msrb.mxu3 %v259_v52  ;;  %v2060_v27 = vunpack.i.l.bf16 %v2059_v16  ;;  %v2061_v33 = vunpack.i.h.bf16 %v2059_v16  ;;  %v606_v52 = vsel %vm601_vm4, %v2065_v50, %v2066_v49  ;;  %v2132_v16 = vpack.i.bf16 %v1364_v14, %v1363_v13  ;;  %v1557_v13 = vld.sshfl [vmem:[#allocation1 + $0x18] sm:$0xff pattern:$0x75316420] }
  0xa2   :  { %v2069_v51 = vpop.permute.xlu0 %2068  ;;  %v614_v55 = vpack.c.bf16 %v606_v52, %v606_v52 }
  0xa3   :  { %v406_v35 = vsel %vm404_vm3, %v399_v30, %v2060_v27  ;;  %v405_v38 = vsel %vm404_vm3, %v2060_v27, %v2061_v33  ;;  %v412_v42 = vsel %vm404_vm3, %v2061_v33, %v2055_v57  ;;  %v2071_v19 = vunpack.i.h.bf16 %v2069_v51  ;;  %v1165_v57 = vld.sshfl [vmem:[#allocation1 + $0x28] sm:$0xff pattern:$0x75316420] }
  0xa4   :  { %v420_v40 = vpack.c.bf16 %v406_v35, %v406_v35  ;;  %v421_v41 = vpack.c.bf16 %v405_v38, %v405_v38  ;;  %v422_v46 = vpack.c.bf16 %v412_v42, %v412_v42  ;;  %v2070_v20 = vunpack.i.l.bf16 %v2069_v51  ;;  %1354 = vst [vmem:[#allocation1 + $0x20] ss:$2 sm:$0xff] %v2236_v4  ;;  %v1358_v38 = vld.sshfl [vmem:[#allocation1 + $0x8] sm:$0xff pattern:$0x75316420] }
  0xa5   :  { %v607_v53 = vsel %vm601_vm4, %v2071_v19, %v2065_v50  ;;  %v630_v61 = vsel %vm100_vm1, %v614_v55, 0  ;;  %1547 = vst [vmem:[#allocation1] ss:$2 sm:$0xff] %v2234_v3 }
  0xa6   :  { %v442_v44 = vsel %vm100_vm1, %v420_v40, 0  ;;  %v445_v45 = vsel %vm100_vm1, %v421_v41, 0  ;;  %v448_v48 = vsel %vm100_vm1, %v422_v46, 0  ;;  %v608_v21 = vsel %vm601_vm4, %v2070_v20, %v2071_v19  ;;  %1186 = vrot.lane.b32.xlu2 %v1165_v57, %s2186_s9  ;;  %2133 = vrot.lane.b32.xlu0 %v2132_v16, %s2187_s12  ;;  %s1932_s9 = sshll.u32 %s2772_s6, 4  ;;  %s1933_s9 = int_to_ptr.hbm [resolvable:$true] %s1932_s9 }
  0xa7   :  { %v612_v23 = vpack.c.bf16 %v608_v21, %v608_v21  ;;  %v613_v54 = vpack.c.bf16 %v607_v53, %v607_v53  ;;  %v2127_v40 = vpack.i.bf16 %v1358_v38, %v1357_v34 }
  0xa8   :  { %v594_v22 = vpop.permute.xlu2 %593 }
  0xa9   :  { %v605_v59 = vsel %vm601_vm4, %v2066_v49, %v594_v22  ;;  %v624_v24 = vsel %vm100_vm1, %v612_v23, 0  ;;  %v627_v60 = vsel %vm100_vm1, %v613_v54, 0 }
  0xaa   :  { %1952 = vmatmul.msk.bf16.vlgmr.msra.gmra.mxu2 %vm96_vm2, %v31_v6  ;;  %v615_v62 = vpack.c.bf16 %v605_v59, %v605_v59  ;;  %v2079_v33 = vpop.permute.xlu0 %2078 }
  0xab   :  { %1951 = vmatmul.msk.bf16.vlgmr.msra.gmra.mxu1 %vm96_vm2, %v31_v6  ;;  %1950 = vmatmul.msk.bf16.vlgmr.msra.gmra.mxu0 %vm96_vm2, %v31_v6  ;;  %v1362_v12 = vld.sshfl [vmem:[#allocation1 + $0x28] sm:$0xff pattern:$0x75316420]  ;;  %v2081_v35 = vunpack.i.h.bf16 %v2079_v33  ;;  %v2080_v36 = vunpack.i.l.bf16 %v2079_v33 }
  0xac   :  { %457 = vmatpush.bf16.msra.mxu0 %v427_v8  ;;  %470 = vmatpush.bf16.msra.mxu1 %v430_v9  ;;  %v1361_v8 = vld.sshfl [vmem:[#allocation1 + $0x20] sm:$0xff pattern:$0x75316420]  ;;  %v1555_v52 = vld.sshfl [vmem:[#allocation1 + $0x8] sm:$0xff pattern:$0x75316420] }
  0xad   :  { %483 = vmatpush.bf16.msra.mxu2 %v433_v10  ;;  %v633_v10 = vsel %vm100_vm1, %v615_v62, 0  ;;  %1381 = vrot.lane.b32.xlu1 %v1361_v8, %s2187_s12  ;;  %1551 = vst [vmem:[#allocation1 + $0x20] ss:$2 sm:$0xff] %v2236_v4  ;;  %v803_v41 = vsel %vm798_vm5, %v2080_v36, %v2081_v35 }
  0xae   :  { %2128 = vrot.lane.b32.xlu2 %v2127_v40, %s2187_s12  ;;  %v811_v47 = vpack.c.bf16 %v803_v41, %v803_v41 }
  0xb0   :  { %1953 = vmatmul.msk.bf16.vlgmr.msra.gmra.mxu3 %vm96_vm2, %v31_v6  ;;  %v596_v9 = vpop.permute.xlu2 %595  ;;  %v827_v51 = vsel %vm100_vm1, %v811_v47, 0 }
  0xb1   :  { %496 = vmatpush.bf16.msra.mxu3 %v436_v31  ;;  %v604_v2 = vsel %vm601_vm4, %v594_v22, %v596_v9 }
  0xb2   :  { %v616_v26 = vpack.c.bf16 %v604_v2, %v604_v2  ;;  %v2089_v23 = vpop.permute.xlu0 %2088 }
  0xb3   :  { %v2090_v54 = vunpack.i.l.bf16 %v2089_v23  ;;  %v2091_v57 = vunpack.i.h.bf16 %v2089_v23 }
  0xb4   :  { %v636_v29 = vsel %vm100_vm1, %v616_v26, 0  ;;  %v1558_v19 = vld.sshfl [vmem:[#allocation1 + $0x20] sm:$0xff pattern:$0x75316420] }
  0xb5   :  { %1383 = vrot.lane.b32.xlu1 %v1362_v12, %s2187_s12  ;;  %1578 = vrot.lane.b32.xlu0 %v1558_v19, %s2188_s15  ;;  %v1556_v12 = vld.sshfl [vmem:[#allocation1 + $0x10] sm:$0xff pattern:$0x75316420] }
  0xb6   :  { %v2137_v16 = vpack.i.bf16 %v1557_v13, %v1556_v12 }
  0xb8   :  { %v2084_v37 = vpop.permute.xlu2 %2083  ;;  %2138 = vrot.lane.b32.xlu2 %v2137_v16, %s2188_s15 }
  0xb9   :  { %v2086_v17 = vunpack.i.h.bf16 %v2084_v37  ;;  %v2085_v39 = vunpack.i.l.bf16 %v2084_v37 }
  0xba   :  { %1956 = vmatmul.msk.bf16.vlgmr.msrb.gmra.mxu2 %vm96_vm2, %v31_v6  ;;  %v988_v14 = vpop.permute.xlu0 %987 }
  0xbb   :  { %1954 = vmatmul.msk.bf16.vlgmr.msrb.gmra.mxu0 %vm96_vm2, %v31_v6  ;;  %1955 = vmatmul.msk.bf16.vlgmr.msrb.gmra.mxu1 %vm96_vm2, %v31_v6  ;;  %v806_v63 = vsel %vm798_vm5, %v2091_v57, %v2085_v39 }
  0xbc   :  { %509 = vmatpush.bf16.msrb.mxu0 %v439_v43  ;;  %522 = vmatpush.bf16.msrb.mxu1 %v442_v44  ;;  %v805_v43 = vsel %vm798_vm5, %v2085_v39, %v2086_v17  ;;  %v804_v44 = vsel %vm798_vm5, %v2086_v17, %v2080_v36  ;;  %v1560_v17 = vld.sshfl [vmem:[#allocation1 + $0x30] sm:$0xff pattern:$0x75316420]  ;;  %v1561_v39 = vld.sshfl [vmem:[#allocation1 + $0x38] sm:$0xff pattern:$0x75316420] }
  0xbd   :  { %535 = vmatpush.bf16.msrb.mxu2 %v445_v45  ;;  %v809_v45 = vpack.c.bf16 %v805_v43, %v805_v43  ;;  %v810_v46 = vpack.c.bf16 %v804_v44, %v804_v44  ;;  %v2147_v43 = vpack.i.bf16 %v1561_v39, %v1560_v17 }
  0xbf   :  { %v821_v49 = vsel %vm100_vm1, %v809_v45, 0  ;;  %v824_v50 = vsel %vm100_vm1, %v810_v46, 0 }
  0xc0   :  { %1957 = vmatmul.msk.bf16.vlgmr.msrb.gmra.mxu3 %vm96_vm2, %v31_v6  ;;  %v2074_v6 = vpop.permute.xlu1 %2073  ;;  %2148 = vrot.lane.b32.xlu2 %v2147_v43, %s2188_s15 }
  0xc1   :  { %548 = vmatpush.bf16.msrb.mxu3 %v448_v48  ;;  %v2075_v7 = vunpack.i.l.bf16 %v2074_v6  ;;  %v2076_v11 = vunpack.i.h.bf16 %v2074_v6  ;;  %v1967_v48 = vld [vmem:[%s2768_s2 + $0xc] sm:$0xf] }
  0xc2   :  { %v990_v40 = vpop.permute.xlu0 %989 }
  0xc3   :  { %v603_v15 = vsel %vm601_vm4, %v596_v9, %v2075_v7  ;;  %v602_v25 = vsel %vm601_vm4, %v2075_v7, %v2076_v11  ;;  %v609_v4 = vsel %vm601_vm4, %v2076_v11, %v2070_v20  ;;  %v1554_v20 = vld.sshfl [vmem:[#allocation1] sm:$0xff pattern:$0x75316420]  ;;  %v816_v7 = vpack.c.bf16 %v806_v63, %v806_v63 }
  0xc4   :  { %v617_v27 = vpack.c.bf16 %v603_v15, %v603_v15  ;;  %v618_v28 = vpack.c.bf16 %v602_v25, %v602_v25  ;;  %v619_v31 = vpack.c.bf16 %v609_v4, %v609_v4  ;;  %v2142_v21 = vpack.i.bf16 %v1555_v52, %v1554_v20 }
  0xc5   :  { %v842_v8 = vsel %vm100_vm1, %v816_v7, 0  ;;  %v998_v47 = vsel %vm995_vm6, %v988_v14, %v990_v40 }
  0xc6   :  { %v639_v30 = vsel %vm100_vm1, %v617_v27, 0  ;;  %v642_v5 = vsel %vm100_vm1, %v618_v28, 0  ;;  %v645_v32 = vsel %vm100_vm1, %v619_v31, 0  ;;  %2143 = vrot.lane.b32.xlu1 %v2142_v21, %s2188_s15  ;;  %v1976_v28 = vld [vmem:[%s2768_s2 + $0x10] sm:$0xf] }
  0xc8   :  { %v791_v42 = vpop.permute.xlu1 %790 }
  0xc9   :  { %v802_v3 = vsel %vm798_vm5, %v2081_v35, %v791_v42 }
  0xca   :  { %1961 = vmatmul.msk.bf16.vlgmr.msra.gmra.mxu2 %vm96_vm2, %v1958_v58  ;;  %v812_v18 = vpack.c.bf16 %v802_v3, %v802_v3 }
  0xcb   :  { %1959 = vmatmul.msk.bf16.vlgmr.msra.gmra.mxu0 %vm96_vm2, %v1958_v58  ;;  %1960 = vmatmul.msk.bf16.vlgmr.msra.gmra.mxu1 %vm96_vm2, %v1958_v58 }
  0xcc   :  { %654 = vmatpush.bf16.msra.mxu0 %v624_v24  ;;  %667 = vmatpush.bf16.msra.mxu1 %v627_v60  ;;  %v830_v22 = vsel %vm100_vm1, %v812_v18, 0  ;;  %v799_v24 = vsel %vm798_vm5, %v2090_v54, %v2091_v57  ;;  %v1010_v18 = vpack.c.bf16 %v998_v47, %v998_v47 }
  0xcd   :  { %680 = vmatpush.bf16.msra.mxu2 %v630_v61  ;;  %v815_v62 = vpack.c.bf16 %v799_v24, %v799_v24 }
  0xcf   :  { %v839_v6 = vsel %vm100_vm1, %v815_v62, 0 }
  0xd0   :  { %1962 = vmatmul.msk.bf16.vlgmr.msra.gmra.mxu3 %vm96_vm2, %v1958_v58  ;;  %v793_v53 = vpop.permute.xlu1 %792 }
  0xd1   :  { %693 = vmatpush.bf16.msra.mxu3 %v633_v10  ;;  %v801_v55 = vsel %vm798_vm5, %v791_v42, %v793_v53  ;;  %v800_v59 = vsel %vm798_vm5, %v793_v53, %v2090_v54 }
  0xd2   :  { %v813_v60 = vpack.c.bf16 %v801_v55, %v801_v55  ;;  %v814_v61 = vpack.c.bf16 %v800_v59, %v800_v59 }
  0xd4   :  { %v833_v0 = vsel %vm100_vm1, %v813_v60, 0  ;;  %v836_v1 = vsel %vm100_vm1, %v814_v61, 0 }
  0xd8   :  { %v2099_v15 = vpop.permute.xlu1 %2098 }
  0xd9   :  { %v2101_v25 = vunpack.i.h.bf16 %v2099_v15  ;;  %v2100_v26 = vunpack.i.l.bf16 %v2099_v15 }
  0xda   :  { %1965 = vmatmul.msk.bf16.vlgmr.msrb.gmra.mxu2 %vm96_vm2, %v1958_v58 }
  0xdb   :  { %1963 = vmatmul.msk.bf16.vlgmr.msrb.gmra.mxu0 %vm96_vm2, %v1958_v58  ;;  %1964 = vmatmul.msk.bf16.vlgmr.msrb.gmra.mxu1 %vm96_vm2, %v1958_v58 }
  0xdc   :  { %706 = vmatpush.bf16.msrb.mxu0 %v636_v29  ;;  %719 = vmatpush.bf16.msrb.mxu1 %v639_v30  ;;  %v1002_v30 = vsel %vm995_vm6, %v2100_v26, %v2101_v25 }
  0xdd   :  { %732 = vmatpush.bf16.msrb.mxu2 %v642_v5 }
  0xe0   :  { %1966 = vmatmul.msk.bf16.vlgmr.msrb.gmra.mxu3 %vm96_vm2, %v1958_v58  ;;  %v1559_v58 = vld.sshfl [vmem:[#allocation1 + $0x28] sm:$0xff pattern:$0x75316420] }
  0xe1   :  { %745 = vmatpush.bf16.msrb.mxu3 %v645_v32  ;;  %1580 = vrot.lane.b32.xlu0 %v1559_v58, %s2188_s15  ;;  %v1006_v32 = vpack.c.bf16 %v1002_v30, %v1002_v30 }
  0xe3   :  { %v1018_v35 = vsel %vm100_vm1, %v1006_v32, 0 }
  0xe8   :  { %v2094_v9 = vpop.permute.xlu2 %2093 }
  0xe9   :  { %v2096_v10 = vunpack.i.h.bf16 %v2094_v9  ;;  %v2095_v11 = vunpack.i.l.bf16 %v2094_v9 }
  0xea   :  { %1970 = vmatmul.msk.bf16.vlgmr.msra.gmra.mxu2 %vm96_vm2, %v1967_v48 }
  0xeb   :  { %1969 = vmatmul.msk.bf16.vlgmr.msra.gmra.mxu1 %vm96_vm2, %v1967_v48  ;;  %1968 = vmatmul.msk.bf16.vlgmr.msra.gmra.mxu0 %vm96_vm2, %v1967_v48  ;;  %v1000_v2 = vsel %vm995_vm6, %v2095_v11, %v2096_v10  ;;  %v1001_v5 = vsel %vm995_vm6, %v2101_v25, %v2095_v11  ;;  %v999_v31 = vsel %vm995_vm6, %v2096_v10, %v988_v14 }
  0xec   :  { %851 = vmatpush.bf16.msra.mxu0 %v821_v49  ;;  %864 = vmatpush.bf16.msra.mxu1 %v824_v50  ;;  %v1008_v27 = vpack.c.bf16 %v1000_v2, %v1000_v2  ;;  %v1007_v33 = vpack.c.bf16 %v1001_v5, %v1001_v5  ;;  %v1009_v37 = vpack.c.bf16 %v999_v31, %v999_v31  ;;  %v1985_v2 = vld [vmem:[%s2768_s2 + $0x14] sm:$0xf] }
  0xed   :  { %877 = vmatpush.bf16.msra.mxu2 %v827_v51 }
  0xee   :  { %v1024_v34 = vsel %vm100_vm1, %v1008_v27, 0  ;;  %v1021_v36 = vsel %vm100_vm1, %v1007_v33, 0  ;;  %v1027_v41 = vsel %vm100_vm1, %v1009_v37, 0 }
  0xf0   :  { %1971 = vmatmul.msk.bf16.vlgmr.msra.gmra.mxu3 %vm96_vm2, %v1967_v48  ;;  %v2104_v42 = vpop.permute.xlu2 %2103 }
  0xf1   :  { %890 = vmatpush.bf16.msra.mxu3 %v830_v22  ;;  %v2105_v46 = vunpack.i.l.bf16 %v2104_v42  ;;  %v1030_v22 = vsel %vm100_vm1, %v1010_v18, 0 }
  0xf3   :  { %v997_v49 = vsel %vm995_vm6, %v990_v40, %v2105_v46 }
  0xf4   :  { %v1011_v19 = vpack.c.bf16 %v997_v49, %v997_v49 }
  0xf6   :  { %v1033_v23 = vsel %vm100_vm1, %v1011_v19, 0 }
  0xf8   :  { %v1185_v9 = vpop.permute.xlu2 %1184 }
  0xfa   :  { %1974 = vmatmul.msk.bf16.vlgmr.msrb.gmra.mxu2 %vm96_vm2, %v1967_v48 }
  0xfb   :  { %1972 = vmatmul.msk.bf16.vlgmr.msrb.gmra.mxu0 %vm96_vm2, %v1967_v48  ;;  %1973 = vmatmul.msk.bf16.vlgmr.msrb.gmra.mxu1 %vm96_vm2, %v1967_v48 }
  0xfc   :  { %903 = vmatpush.bf16.msrb.mxu0 %v833_v0  ;;  %916 = vmatpush.bf16.msrb.mxu1 %v836_v1 }
  0xfd   :  { %929 = vmatpush.bf16.msrb.mxu2 %v839_v6 }
 0x100   :  { %1975 = vmatmul.msk.bf16.vlgmr.msrb.gmra.mxu3 %vm96_vm2, %v1967_v48  ;;  %v2106_v48 = vunpack.i.h.bf16 %v2104_v42 }
 0x101   :  { %942 = vmatpush.bf16.msrb.mxu3 %v842_v8 }
 0x102   :  { %v996_v50 = vsel %vm995_vm6, %v2105_v46, %v2106_v48  ;;  %v1003_v53 = vsel %vm995_vm6, %v2106_v48, %v2100_v26 }
 0x103   :  { %v1012_v20 = vpack.c.bf16 %v996_v50, %v996_v50  ;;  %v1013_v55 = vpack.c.bf16 %v1003_v53, %v1003_v53 }
 0x105   :  { %v1036_v54 = vsel %vm100_vm1, %v1012_v20, 0  ;;  %v1039_v59 = vsel %vm100_vm1, %v1013_v55, 0 }
 0x106   :  { %v2109_v61 = vpop.permute.xlu1 %2108 }
 0x107   :  { %v2111_v62 = vunpack.i.h.bf16 %v2109_v61  ;;  %v2110_v63 = vunpack.i.l.bf16 %v2109_v61  ;;  %v2114_v0 = vpop.permute.xlu0 %2113 }
 0x108   :  { %v2479_v4 = vpop.f32.mrf.mxu0  ;;  %v2481_v29 = vpop.f32.mrf.mxu1  ;;  %v2116_v6 = vunpack.i.h.bf16 %v2114_v0  ;;  %v2115_v7 = vunpack.i.l.bf16 %v2114_v0 }
 0x109   :  { %v1197_v10 = vsel %vm1192_vm7, %v2110_v63, %v2111_v62  ;;  %v1196_v26 = vsel %vm1192_vm7, %v2111_v62, %v1185_v9 }
 0x10a   :  { %1979 = vmatmul.msk.bf16.vlgmr.msra.gmra.mxu2 %vm96_vm2, %v1976_v28  ;;  %v1199_v11 = vsel %vm1192_vm7, %v2115_v7, %v2116_v6  ;;  %v1198_v12 = vsel %vm1192_vm7, %v2116_v6, %v2110_v63  ;;  %v1205_v13 = vpack.c.bf16 %v1197_v10, %v1197_v10  ;;  %v1206_v32 = vpack.c.bf16 %v1196_v26, %v1196_v26 }
 0x10b   :  { %1978 = vmatmul.msk.bf16.vlgmr.msra.gmra.mxu1 %vm96_vm2, %v1976_v28  ;;  %1977 = vmatmul.msk.bf16.vlgmr.msra.gmra.mxu0 %vm96_vm2, %v1976_v28  ;;  %v1203_v14 = vpack.c.bf16 %v1199_v11, %v1199_v11  ;;  %v1204_v15 = vpack.c.bf16 %v1198_v12, %v1198_v12 }
 0x10c   :  { %1048 = vmatpush.bf16.msra.mxu0 %v1018_v35  ;;  %1061 = vmatpush.bf16.msra.mxu1 %v1021_v36  ;;  %v1221_v31 = vsel %vm100_vm1, %v1205_v13, 0  ;;  %v1224_v35 = vsel %vm100_vm1, %v1206_v32, 0 }
 0x10d   :  { %v2495_v38 = vpop.f32.mrf.mxu2  ;;  %1074 = vmatpush.bf16.msra.mxu2 %v1024_v34  ;;  %v1215_v30 = vsel %vm100_vm1, %v1203_v14, 0  ;;  %v1218_v5 = vsel %vm100_vm1, %v1204_v15, 0  ;;  %v1187_v34 = vpop.permute.xlu2 %1186 }
 0x10e   :  { %v1195_v40 = vsel %vm1192_vm7, %v1185_v9, %v1187_v34 }
 0x10f   :  { %v2119_v36 = vpop.permute.xlu1 %2118  ;;  %v1207_v46 = vpack.c.bf16 %v1195_v40, %v1195_v40 }
 0x110   :  { %v136_v44 = vpop.f32.mrf.mxu0  ;;  %v149_v45 = vpop.f32.mrf.mxu1  ;;  %1980 = vmatmul.msk.bf16.vlgmr.msra.gmra.mxu3 %vm96_vm2, %v1976_v28  ;;  %v2120_v39 = vunpack.i.l.bf16 %v2119_v36 }
 0x111   :  { %1087 = vmatpush.bf16.msra.mxu3 %v1027_v41  ;;  %v2121_v41 = vunpack.i.h.bf16 %v2119_v36  ;;  %v1227_v20 = vsel %vm100_vm1, %v1207_v46, 0 }
 0x112   :  { %v1194_v43 = vsel %vm1192_vm7, %v1187_v34, %v2120_v39 }
 0x113   :  { %v2502_v3 = vpop.f32.mrf.mxu3  ;;  %v1208_v47 = vpack.c.bf16 %v1194_v43, %v1194_v43 }
 0x115   :  { %v162_v51 = vpop.f32.mrf.mxu2  ;;  %v2129_v61 = vpop.permute.xlu2 %2128 }
 0x116   :  { %v1200_v51 = vsel %vm1192_vm7, %v2121_v41, %v2115_v7  ;;  %v2131_v62 = vunpack.i.h.bf16 %v2129_v61  ;;  %v2130_v63 = vunpack.i.l.bf16 %v2129_v61 }
 0x118   :  { %v2508_v52 = vpop.f32.mrf.mxu0  ;;  %v2510_v21 = vpop.f32.mrf.mxu1  ;;  %v1396_v9 = vsel %vm1389_vm8, %v2130_v63, %v2131_v62 }
 0x119   :  { %v1400_v11 = vpack.c.bf16 %v1396_v9, %v1396_v9 }
 0x11a   :  { %1983 = vmatmul.msk.bf16.vlgmr.msrb.gmra.mxu2 %vm96_vm2, %v1976_v28 }
 0x11b   :  { %1981 = vmatmul.msk.bf16.vlgmr.msrb.gmra.mxu0 %vm96_vm2, %v1976_v28  ;;  %1982 = vmatmul.msk.bf16.vlgmr.msrb.gmra.mxu1 %vm96_vm2, %v1976_v28  ;;  %v175_v57 = vpop.f32.mrf.mxu3  ;;  %v1412_v26 = vsel %vm100_vm1, %v1400_v11, 0 }
 0x11c   :  { %1100 = vmatpush.bf16.msrb.mxu0 %v1030_v22  ;;  %1113 = vmatpush.bf16.msrb.mxu1 %v1033_v23  ;;  %v1210_v22 = vpack.c.bf16 %v1200_v51, %v1200_v51 }
 0x11d   :  { %v2520_v58 = vpop.f32.mrf.mxu2  ;;  %1126 = vmatpush.bf16.msrb.mxu2 %v1036_v54 }
 0x11e   :  { %v1236_v54 = vsel %vm100_vm1, %v1210_v22, 0 }
 0x120   :  { %v188_v24 = vpop.f32.mrf.mxu0  ;;  %v201_v60 = vpop.f32.mrf.mxu1  ;;  %1984 = vmatmul.msk.bf16.vlgmr.msrb.gmra.mxu3 %vm96_vm2, %v1976_v28 }
 0x121   :  { %1139 = vmatpush.bf16.msrb.mxu3 %v1039_v59  ;;  %v2124_v59 = vpop.permute.xlu0 %2123 }
 0x122   :  { %v2126_v24 = vunpack.i.h.bf16 %v2124_v59  ;;  %v2125_v60 = vunpack.i.l.bf16 %v2124_v59 }
 0x123   :  { %v2525_v1 = vpop.f32.mrf.mxu3 }
 0x124   :  { %v1395_v10 = vsel %vm1389_vm8, %v2131_v62, %v2125_v60 }
 0x125   :  { %v214_v8 = vpop.f32.mrf.mxu2  ;;  %v1401_v12 = vpack.c.bf16 %v1395_v10, %v1395_v10 }
 0x126   :  { %v1382_v8 = vpop.permute.xlu1 %1381 }
 0x128   :  { %v270_v16 = vpop.f32.mrf.mxu0  ;;  %v283_v25 = vpop.f32.mrf.mxu1 }
 0x129   :  { %v2539_v27 = vadd.f32 %v270_v16, %v2479_v4  ;;  %v2542_v28 = vadd.f32 %v283_v25, %v2481_v29  ;;  %v2134_v34 = vpop.permute.xlu0 %2133 }
 0x12a   :  { %1988 = vmatmul.msk.bf16.vlgmr.msra.gmra.mxu2 %vm96_vm2, %v1985_v2 }
 0x12b   :  { %1986 = vmatmul.msk.bf16.vlgmr.msra.gmra.mxu0 %vm96_vm2, %v1985_v2  ;;  %1987 = vmatmul.msk.bf16.vlgmr.msra.gmra.mxu1 %vm96_vm2, %v1985_v2  ;;  %v227_v33 = vpop.f32.mrf.mxu3 }
 0x12c   :  { %1245 = vmatpush.bf16.msra.mxu0 %v1215_v30  ;;  %1258 = vmatpush.bf16.msra.mxu1 %v1218_v5  ;;  %v1415_v30 = vsel %vm100_vm1, %v1401_v12, 0  ;;  %v2656_v12 = vld [vmem:[%s2768_s2 + $0x1c] sm:$0xf] }
 0x12d   :  { %v296_v4 = vpop.f32.mrf.mxu2  ;;  %1271 = vmatpush.bf16.msra.mxu2 %v1221_v31 }
 0x12e   :  { %v2551_v29 = vadd.f32 %v296_v4, %v2495_v38  ;;  %v1193_v38 = vsel %vm1192_vm7, %v2120_v39, %v2121_v41  ;;  %v1384_v33 = vpop.permute.xlu1 %1383  ;;  %v2136_v39 = vunpack.i.h.bf16 %v2134_v34 }
 0x12f   :  { %v1209_v48 = vpack.c.bf16 %v1193_v38, %v1193_v38 }
 0x130   :  { %v272_v37 = vpop.f32.mrf.mxu0  ;;  %v285_v17 = vpop.f32.mrf.mxu1  ;;  %1989 = vmatmul.msk.bf16.vlgmr.msra.gmra.mxu3 %vm96_vm2, %v1985_v2 }
 0x131   :  { %1284 = vmatpush.bf16.msra.mxu3 %v1224_v35  ;;  %v1233_v53 = vsel %vm100_vm1, %v1209_v48, 0  ;;  %v2135_v37 = vunpack.i.l.bf16 %v2134_v34  ;;  %v1392_v17 = vsel %vm1389_vm8, %v1382_v8, %v1384_v33 }
 0x132   :  { %v1404_v38 = vpack.c.bf16 %v1392_v17, %v1392_v17 }
 0x133   :  { %v309_v42 = vpop.f32.mrf.mxu3  ;;  %v1391_v41 = vsel %vm1389_vm8, %v1384_v33, %v2135_v37 }
 0x134   :  { %v2562_v44 = vadd.f32 %v309_v42, %v2502_v3  ;;  %v1230_v3 = vsel %vm100_vm1, %v1208_v47, 0 }
 0x135   :  { %v298_v45 = vpop.f32.mrf.mxu2 }
 0x136   :  { %v1405_v45 = vpack.c.bf16 %v1391_v41, %v1391_v41 }
 0x138   :  { %v322_v49 = vpop.f32.mrf.mxu0  ;;  %v335_v50 = vpop.f32.mrf.mxu1 }
 0x139   :  { %v2567_v18 = vadd.f32 %v322_v49, %v2508_v52  ;;  %v2570_v19 = vadd.f32 %v335_v50, %v2510_v21  ;;  %v1397_v49 = vsel %vm1389_vm8, %v2136_v39, %v2130_v63 }
 0x13a   :  { %1992 = vmatmul.msk.bf16.vlgmr.msrb.gmra.mxu2 %vm96_vm2, %v1985_v2 }
 0x13b   :  { %1990 = vmatmul.msk.bf16.vlgmr.msrb.gmra.mxu0 %vm96_vm2, %v1985_v2  ;;  %1991 = vmatmul.msk.bf16.vlgmr.msrb.gmra.mxu1 %vm96_vm2, %v1985_v2  ;;  %v311_v23 = vpop.f32.mrf.mxu3 }
 0x13c   :  { %1297 = vmatpush.bf16.msrb.mxu0 %v1227_v20  ;;  %1310 = vmatpush.bf16.msrb.mxu1 %v1230_v3  ;;  %v1424_v20 = vsel %vm100_vm1, %v1404_v38, 0 }
 0x13d   :  { %v348_v52 = vpop.f32.mrf.mxu2  ;;  %1323 = vmatpush.bf16.msrb.mxu2 %v1233_v53  ;;  %v1407_v53 = vpack.c.bf16 %v1397_v49, %v1397_v49 }
 0x13e   :  { %v2579_v21 = vadd.f32 %v348_v52, %v2520_v58  ;;  %v1394_v58 = vsel %vm1389_vm8, %v2125_v60, %v2126_v24 }
 0x13f   :  { %v1402_v13 = vpack.c.bf16 %v1394_v58, %v1394_v58  ;;  %v1433_v23 = vsel %vm100_vm1, %v1407_v53, 0 }
 0x140   :  { %v324_v55 = vpop.f32.mrf.mxu0  ;;  %v337_v57 = vpop.f32.mrf.mxu1  ;;  %1993 = vmatmul.msk.bf16.vlgmr.msrb.gmra.mxu3 %vm96_vm2, %v1985_v2  ;;  %v1994_v2 = vld [vmem:[%s2768_s2 + $0x18] sm:$0xf] }
 0x141   :  { %1336 = vmatpush.bf16.msrb.mxu3 %v1236_v54  ;;  %v1418_v5 = vsel %vm100_vm1, %v1402_v13, 0  ;;  %v2139_v55 = vpop.permute.xlu2 %2138  ;;  %v2144_v57 = vpop.permute.xlu1 %2143 }
 0x142   :  { %v2141_v59 = vunpack.i.h.bf16 %v2139_v55  ;;  %v2146_v60 = vunpack.i.h.bf16 %v2144_v57  ;;  %v2145_v61 = vunpack.i.l.bf16 %v2144_v57 }
 0x143   :  { %v361_v0 = vpop.f32.mrf.mxu3 }
 0x144   :  { %v2587_v6 = vadd.f32 %v361_v0, %v2525_v1  ;;  %v1393_v1 = vsel %vm1389_vm8, %v2126_v24, %v1382_v8  ;;  %v2140_v24 = vunpack.i.l.bf16 %v2139_v55  ;;  %v1579_v8 = vpop.permute.xlu0 %1578 }
 0x145   :  { %v350_v7 = vpop.f32.mrf.mxu2  ;;  %v1403_v31 = vpack.c.bf16 %v1393_v1, %v1393_v1 }
 0x146   :  { %v1592_v63 = vsel %vm1586_vm9, %v2146_v60, %v2140_v24  ;;  %v1591_v0 = vsel %vm1586_vm9, %v2140_v24, %v2141_v59 }
 0x147   :  { %v1421_v4 = vsel %vm100_vm1, %v1403_v31, 0  ;;  %v1598_v10 = vpack.c.bf16 %v1592_v63, %v1592_v63  ;;  %v1599_v11 = vpack.c.bf16 %v1591_v0, %v1591_v0 }
 0x148   :  { %v459_v14 = vpop.f32.mrf.mxu0  ;;  %v472_v15 = vpop.f32.mrf.mxu1 }
 0x149   :  { %v2599_v16 = vadd.f32 %v459_v14, %v2539_v27  ;;  %v2602_v25 = vadd.f32 %v472_v15, %v2542_v28  ;;  %v1590_v14 = vsel %vm1586_vm9, %v2141_v59, %v1579_v8  ;;  %v2149_v31 = vpop.permute.xlu2 %2148  ;;  %v2012_v59 = vld [vmem:[%s2768_s2 + $0x20] sm:$0xf] }
 0x14a   :  { %1997 = vmatmul.msk.bf16.vlgmr.msra.gmra.mxu2 %vm96_vm2, %v1994_v2 }
 0x14b   :  { %1995 = vmatmul.msk.bf16.vlgmr.msra.gmra.mxu0 %vm96_vm2, %v1994_v2  ;;  %1996 = vmatmul.msk.bf16.vlgmr.msra.gmra.mxu1 %vm96_vm2, %v1994_v2  ;;  %v363_v32 = vpop.f32.mrf.mxu3 }
 0x14c   :  { %1442 = vmatpush.bf16.msra.mxu0 %v1412_v26  ;;  %1455 = vmatpush.bf16.msra.mxu1 %v1415_v30  ;;  %v1612_v26 = vsel %vm100_vm1, %v1598_v10, 0  ;;  %v1615_v30 = vsel %vm100_vm1, %v1599_v11, 0 }
 0x14d   :  { %v485_v27 = vpop.f32.mrf.mxu2  ;;  %1468 = vmatpush.bf16.msra.mxu2 %v1418_v5 }
 0x14e   :  { %v2611_v28 = vadd.f32 %v485_v27, %v2551_v29  ;;  %v1390_v29 = vsel %vm1389_vm8, %v2135_v37, %v2136_v39  ;;  %v2150_v27 = vunpack.i.l.bf16 %v2149_v31 }
 0x14f   :  { %v1406_v46 = vpack.c.bf16 %v1390_v29, %v1390_v29 }
 0x150   :  { %v461_v35 = vpop.f32.mrf.mxu0  ;;  %v474_v36 = vpop.f32.mrf.mxu1  ;;  %1998 = vmatmul.msk.bf16.vlgmr.msra.gmra.mxu3 %vm96_vm2, %v1994_v2 }
 0x151   :  { %1481 = vmatpush.bf16.msra.mxu3 %v1421_v4  ;;  %v1430_v3 = vsel %vm100_vm1, %v1406_v46, 0  ;;  %v2151_v36 = vunpack.i.h.bf16 %v2149_v31  ;;  %v1744_v46 = vld [vmem:[%s2769_s3] sm:$0xff] }
 0x153   :  { %v498_v40 = vpop.f32.mrf.mxu3  ;;  %v1581_v33 = vpop.permute.xlu0 %1580  ;;  %v1587_v17 = vsel %vm1586_vm9, %v2150_v27, %v2151_v36  ;;  %v1594_v49 = vsel %vm1586_vm9, %v2151_v36, %v2145_v61 }
 0x154   :  { %v2622_v42 = vadd.f32 %v498_v40, %v2562_v44  ;;  %v1427_v44 = vsel %vm100_vm1, %v1405_v45, 0  ;;  %v1589_v37 = vsel %vm1586_vm9, %v1579_v8, %v1581_v33  ;;  %v2189_v45 = vmov 0  }
 0x155   :  { %v487_v43 = vpop.f32.mrf.mxu2  ;;  %v1601_v29 = vpack.c.bf16 %v1589_v37, %v1589_v37  ;;  %2152 = vset.pattern.permute.xlu1 %v2189_v45  ;;  %2153 = vset.pattern.permute.xlu0 %v2189_v45  ;;  %v1604_v56 = vpack.c.bf16 %v1594_v49, %v1594_v49 }
 0x156   :  { %v1603_v43 = vpack.c.bf16 %v1587_v17, %v1587_v17  ;;  %1747 = vperm.xlu1 %2152, %v1744_v46  }
 0x158   :  { %v511_v47 = vpop.f32.mrf.mxu0  ;;  %v524_v48 = vpop.f32.mrf.mxu1 }
 0x159   :  { %v2627_v50 = vadd.f32 %v511_v47, %v2567_v18  ;;  %v2630_v51 = vadd.f32 %v524_v48, %v2570_v19 }
 0x15a   :  { %2001 = vmatmul.msk.bf16.vlgmr.msrb.gmra.mxu2 %vm96_vm2, %v1994_v2 }
 0x15b   :  { %1999 = vmatmul.msk.bf16.vlgmr.msrb.gmra.mxu0 %vm96_vm2, %v1994_v2  ;;  %2000 = vmatmul.msk.bf16.vlgmr.msrb.gmra.mxu1 %vm96_vm2, %v1994_v2  ;;  %v500_v22 = vpop.f32.mrf.mxu3 }
 0x15c   :  { %1494 = vmatpush.bf16.msrb.mxu0 %v1424_v20  ;;  %1507 = vmatpush.bf16.msrb.mxu1 %v1427_v44  ;;  %v1621_v44 = vsel %vm100_vm1, %v1601_v29, 0 }
 0x15d   :  { %v537_v18 = vpop.f32.mrf.mxu2  ;;  %1520 = vmatpush.bf16.msrb.mxu2 %v1430_v3  ;;  %v1627_v3 = vsel %vm100_vm1, %v1603_v43, 0 }
 0x15e   :  { %v2639_v19 = vadd.f32 %v537_v18, %v2579_v21  ;;  %v1593_v21 = vsel %vm1586_vm9, %v2145_v61, %v2146_v60  ;;  %v1630_v18 = vsel %vm100_vm1, %v1604_v56, 0 }
 0x15f   :  { %v1597_v9 = vpack.c.bf16 %v1593_v21, %v1593_v21 }
 0x160   :  { %v513_v52 = vpop.f32.mrf.mxu0  ;;  %v526_v54 = vpop.f32.mrf.mxu1  ;;  %2002 = vmatmul.msk.bf16.vlgmr.msrb.gmra.mxu3 %vm96_vm2, %v1994_v2 }
 0x161   :  { %1533 = vmatpush.bf16.msrb.mxu3 %v1433_v23  ;;  %v1609_v1 = vsel %vm100_vm1, %v1597_v9, 0 }
 0x163   :  { %v550_v62 = vpop.f32.mrf.mxu3 }
 0x164   :  { %v2651_v58 = vadd.f32 %v550_v62, %v2587_v6 }
 0x165   :  { %v539_v7 = vpop.f32.mrf.mxu2 }
 0x168   :  { %v656_v13 = vpop.f32.mrf.mxu0  ;;  %v669_v2 = vpop.f32.mrf.mxu1 }
 0x169   :  { %v2661_v15 = vadd.f32 %v656_v13, %v2599_v16  ;;  %v2664_v6 = vadd.f32 %v669_v2, %v2602_v25  ;;  %v1600_v16 = vpack.c.bf16 %v1590_v14, %v1590_v14 }
 0x16a   :  { %2006 = vmatmul.msk.bf16.vlgmr.msra.gmra.mxu2 %vm96_vm2, %v2656_v12 }
 0x16b   :  { %2004 = vmatmul.msk.bf16.vlgmr.msra.gmra.mxu0 %vm96_vm2, %v2656_v12  ;;  %2005 = vmatmul.msk.bf16.vlgmr.msra.gmra.mxu1 %vm96_vm2, %v2656_v12  ;;  %v552_v5 = vpop.f32.mrf.mxu3  ;;  %v1618_v4 = vsel %vm100_vm1, %v1600_v16, 0 }
 0x16c   :  { %1639 = vmatpush.bf16.msra.mxu0 %v1609_v1  ;;  %1652 = vmatpush.bf16.msra.mxu1 %v1612_v26 }
 0x16d   :  { %v682_v25 = vpop.f32.mrf.mxu2  ;;  %1665 = vmatpush.bf16.msra.mxu2 %v1615_v30 }
 0x16e   :  { %v753_v32 = vadd.f32 %v682_v25, %v2611_v28  ;;  %v1588_v28 = vsel %vm1586_vm9, %v1581_v33, %v2150_v27 }
 0x16f   :  { %v1602_v38 = vpack.c.bf16 %v1588_v28, %v1588_v28 }
 0x170   :  { %v658_v34 = vpop.f32.mrf.mxu0  ;;  %v671_v35 = vpop.f32.mrf.mxu1  ;;  %2007 = vmatmul.msk.bf16.vlgmr.msra.gmra.mxu3 %vm96_vm2, %v2656_v12 }
 0x171   :  { %1678 = vmatpush.bf16.msra.mxu3 %v1618_v4  ;;  %v1624_v53 = vsel %vm100_vm1, %v1602_v38, 0 }
 0x173   :  { %v695_v39 = vpop.f32.mrf.mxu3 }
 0x174   :  { %v754_v40 = vadd.f32 %v695_v39, %v2622_v42 }
 0x175   :  { %v684_v41 = vpop.f32.mrf.mxu2 }
 0x178   :  { %v708_v47 = vpop.f32.mrf.mxu0  ;;  %v721_v48 = vpop.f32.mrf.mxu1 }
 0x179   :  { %v755_v20 = vadd.f32 %v708_v47, %v2627_v50  ;;  %v756_v42 = vadd.f32 %v721_v48, %v2630_v51 }
 0x17a   :  { %2010 = vmatmul.msk.bf16.vlgmr.msrb.gmra.mxu2 %vm96_vm2, %v2656_v12 }
 0x17b   :  { %2008 = vmatmul.msk.bf16.vlgmr.msrb.gmra.mxu0 %vm96_vm2, %v2656_v12  ;;  %2009 = vmatmul.msk.bf16.vlgmr.msrb.gmra.mxu1 %vm96_vm2, %v2656_v12  ;;  %v697_v22 = vpop.f32.mrf.mxu3 }
 0x17c   :  { %1691 = vmatpush.bf16.msrb.mxu0 %v1621_v44  ;;  %1717 = vmatpush.bf16.msrb.mxu2 %v1627_v3 }
 0x17d   :  { %v734_v50 = vpop.f32.mrf.mxu2  ;;  %1704 = vmatpush.bf16.msrb.mxu1 %v1624_v53 }
 0x17e   :  { %v757_v51 = vadd.f32 %v734_v50, %v2639_v19 }
 0x180   :  { %v710_v23 = vpop.f32.mrf.mxu0  ;;  %v723_v52 = vpop.f32.mrf.mxu1  ;;  %2011 = vmatmul.msk.bf16.vlgmr.msrb.gmra.mxu3 %vm96_vm2, %v2656_v12 }
 0x181   :  { %1730 = vmatpush.bf16.msrb.mxu3 %v1630_v18 }
 0x183   :  { %v747_v54 = vpop.f32.mrf.mxu3 }
 0x184   :  { %v758_v55 = vadd.f32 %v747_v54, %v2651_v58 }
 0x185   :  { %v736_v57 = vpop.f32.mrf.mxu2 }
 0x188   :  { %v853_v24 = vpop.f32.mrf.mxu0  ;;  %v866_v60 = vpop.f32.mrf.mxu1 }
 0x189   :  { %v948_v19 = vadd.f32 %v853_v24, %v2661_v15  ;;  %v949_v61 = vadd.f32 %v866_v60, %v2664_v6 }
 0x18a   :  { %2015 = vmatmul.msk.bf16.vlgmr.msra.gmra.mxu2 %vm96_vm2, %v2012_v59 }
 0x18b   :  { %2013 = vmatmul.msk.bf16.vlgmr.msra.gmra.mxu0 %vm96_vm2, %v2012_v59  ;;  %2014 = vmatmul.msk.bf16.vlgmr.msra.gmra.mxu1 %vm96_vm2, %v2012_v59  ;;  %v749_v62 = vpop.f32.mrf.mxu3 }
 0x18d   :  { %v879_v21 = vpop.f32.mrf.mxu2 }
 0x18e   :  { %v950_v63 = vadd.f32 %v879_v21, %v753_v32 }
 0x190   :  { %v855_v0 = vpop.f32.mrf.mxu0  ;;  %v868_v58 = vpop.f32.mrf.mxu1  ;;  %2016 = vmatmul.msk.bf16.vlgmr.msra.gmra.mxu3 %vm96_vm2, %v2012_v59 }
 0x193   :  { %v892_v7 = vpop.f32.mrf.mxu3 }
 0x194   :  { %v951_v8 = vadd.f32 %v892_v7, %v754_v40 }
 0x195   :  { %v881_v9 = vpop.f32.mrf.mxu2 }
 0x198   :  { %v918_v10 = vpop.f32.mrf.mxu1  ;;  %v905_v11 = vpop.f32.mrf.mxu0 }
 0x199   :  { %v953_v12 = vadd.f32 %v918_v10, %v756_v42  ;;  %v952_v13 = vadd.f32 %v905_v11, %v755_v20 }
 0x19a   :  { %2019 = vmatmul.msk.bf16.vlgmr.msrb.gmra.mxu2 %vm96_vm2, %v2012_v59 }
 0x19b   :  { %2017 = vmatmul.msk.bf16.vlgmr.msrb.gmra.mxu0 %vm96_vm2, %v2012_v59  ;;  %2018 = vmatmul.msk.bf16.vlgmr.msrb.gmra.mxu1 %vm96_vm2, %v2012_v59  ;;  %v894_v2 = vpop.f32.mrf.mxu3 }
 0x19d   :  { %v931_v14 = vpop.f32.mrf.mxu2 }
 0x19e   :  { %v954_v15 = vadd.f32 %v931_v14, %v757_v51 }
 0x1a0   :  { %v907_v6 = vpop.f32.mrf.mxu0  ;;  %v920_v1 = vpop.f32.mrf.mxu1  ;;  %2020 = vmatmul.msk.bf16.vlgmr.msrb.gmra.mxu3 %vm96_vm2, %v2012_v59 }
 0x1a3   :  { %v944_v26 = vpop.f32.mrf.mxu3 }
 0x1a4   :  { %v955_v30 = vadd.f32 %v944_v26, %v758_v55 }
 0x1a5   :  { %v933_v16 = vpop.f32.mrf.mxu2 }
 0x1a8   :  { %v1050_v5 = vpop.f32.mrf.mxu0  ;;  %v1063_v25 = vpop.f32.mrf.mxu1 }
 0x1a9   :  { %v1145_v31 = vadd.f32 %v1050_v5, %v948_v19  ;;  %v1146_v32 = vadd.f32 %v1063_v25, %v949_v61 }
 0x1ab   :  { %v946_v27 = vpop.f32.mrf.mxu3 }
 0x1ad   :  { %v1076_v33 = vpop.f32.mrf.mxu2 }
 0x1ae   :  { %v1147_v4 = vadd.f32 %v1076_v33, %v950_v63  ;;  %v1766_v63 = vld [vmem:[%s2767_s1] sm:$0xff] }
 0x1af   :  { %1776 = vst [vmem:[#allocation1] ss:$9 sm:$0xff] %v1766_v63 }
 0x1b0   :  { %v1052_v34 = vpop.f32.mrf.mxu0  ;;  %v1065_v35 = vpop.f32.mrf.mxu1 }
 0x1b3   :  { %v1089_v36 = vpop.f32.mrf.mxu3 }
 0x1b4   :  { %v2720_v37 = vadd.f32 %v1089_v36, %v951_v8 }
 0x1b5   :  { %v1078_v17 = vpop.f32.mrf.mxu2 }
 0x1b8   :  { %v1102_v28 = vpop.f32.mrf.mxu0  ;;  %v1115_v39 = vpop.f32.mrf.mxu1 }
 0x1b9   :  { %v2722_v40 = vadd.f32 %v1102_v28, %v952_v13  ;;  %v2724_v41 = vadd.f32 %v1115_v39, %v953_v12 }
 0x1bb   :  { %v1091_v29 = vpop.f32.mrf.mxu3 }
 0x1bd   :  { %v1128_v43 = vpop.f32.mrf.mxu2 }
 0x1be   :  { %v2726_v38 = vadd.f32 %v1128_v43, %v954_v15 }
 0x1c0   :  { %v1104_v45 = vpop.f32.mrf.mxu0  ;;  %v1117_v46 = vpop.f32.mrf.mxu1 }
 0x1c3   :  { %v1141_v47 = vpop.f32.mrf.mxu3 }
 0x1c4   :  { %v2728_v48 = vadd.f32 %v1141_v47, %v955_v30 }
 0x1c5   :  { %v1130_v49 = vpop.f32.mrf.mxu2 }
 0x1c8   :  { %v1247_v20 = vpop.f32.mrf.mxu0  ;;  %v1260_v42 = vpop.f32.mrf.mxu1 }
 0x1c9   :  { %v1342_v2 = vadd.f32 %v1247_v20, %v1145_v31  ;;  %v1343_v14 = vadd.f32 %v1260_v42, %v1146_v32  ;;  %v2739_v26 = vpop.permute.xlu1 %1747 }
 0x1cb   :  { %v1143_v44 = vpop.f32.mrf.mxu3 }
 0x1cd   :  { %v1273_v3 = vpop.f32.mrf.mxu2 }
 0x1ce   :  { %v1344_v27 = vadd.f32 %v1273_v3, %v1147_v4 }
 0x1d0   :  { %v1249_v53 = vpop.f32.mrf.mxu0  ;;  %v1262_v56 = vpop.f32.mrf.mxu1 }
 0x1d3   :  { %v1286_v22 = vpop.f32.mrf.mxu3 }
 0x1d4   :  { %v1345_v47 = vadd.f32 %v1286_v22, %v2720_v37 }
 0x1d5   :  { %v1275_v50 = vpop.f32.mrf.mxu2 }
 0x1d6   :  { %v1777_v50 = vld [vmem:[#allocation1] sm:$0xff] }
 0x1d8   :  { %v1299_v51 = vpop.f32.mrf.mxu0  ;;  %v1312_v18 = vpop.f32.mrf.mxu1 }
 0x1d9   :  { %v1346_v44 = vadd.f32 %v1299_v51, %v2722_v40  ;;  %v1347_v3 = vadd.f32 %v1312_v18, %v2724_v41  ;;  %v1779_v41 = vld [vmem:[#allocation1 + $0x12] sm:$0xff] }
 0x1db   :  { %v1288_v23 = vpop.f32.mrf.mxu3 }
 0x1dc   :  { %v1778_v23 = vld [vmem:[#allocation1 + $0x9] sm:$0xff] }
 0x1dd   :  { %v2730_v52 = vpop.f32.mrf.mxu2 }
 0x1de   :  { %v1348_v40 = vadd.f32 %v2730_v52, %v2726_v38 }
 0x1e0   :  { %v1301_v54 = vpop.f32.mrf.mxu0  ;;  %v1314_v55 = vpop.f32.mrf.mxu1 }
 0x1e3   :  { %v2732_v57 = vpop.f32.mrf.mxu3 }
 0x1e4   :  { %v1349_v52 = vadd.f32 %v2732_v57, %v2728_v48  ;;  %v1783_v48 = vld [vmem:[#allocation1 + $0x36] sm:$0xff] }
 0x1e5   :  { %v1327_v59 = vpop.f32.mrf.mxu2 }
 0x1e8   :  { %v1444_v24 = vpop.f32.mrf.mxu0  ;;  %v1457_v60 = vpop.f32.mrf.mxu1 }
 0x1e9   :  { %v1539_v6 = vadd.f32 %v1444_v24, %v1342_v2  ;;  %v1540_v1 = vadd.f32 %v1457_v60, %v1343_v14  ;;  %v1780_v2 = vld [vmem:[#allocation1 + $0x1b] sm:$0xff] }
 0x1eb   :  { %v1340_v19 = vpop.f32.mrf.mxu3 }
 0x1ed   :  { %v1470_v61 = vpop.f32.mrf.mxu2 }
 0x1ee   :  { %v1541_v35 = vadd.f32 %v1470_v61, %v1344_v27 }
 0x1f0   :  { %v1446_v62 = vpop.f32.mrf.mxu0  ;;  %v1459_v21 = vpop.f32.mrf.mxu1 }
 0x1f3   :  { %v1483_v0 = vpop.f32.mrf.mxu3 }
 0x1f4   :  { %v1542_v49 = vadd.f32 %v1483_v0, %v1345_v47 }
 0x1f5   :  { %v1472_v58 = vpop.f32.mrf.mxu2 }
 0x1f8   :  { %v1496_v7 = vpop.f32.mrf.mxu0  ;;  %v1509_v8 = vpop.f32.mrf.mxu1 }
 0x1f9   :  { %v1543_v54 = vadd.f32 %v1496_v7, %v1346_v44  ;;  %v1544_v55 = vadd.f32 %v1509_v8, %v1347_v3 }
 0x1fb   :  { %v1485_v9 = vpop.f32.mrf.mxu3 }
 0x1fd   :  { %v1522_v10 = vpop.f32.mrf.mxu2 }
 0x1fe   :  { %v1545_v62 = vadd.f32 %v1522_v10, %v1348_v40 }
 0x200   :  { %v1498_v11 = vpop.f32.mrf.mxu0  ;;  %v1511_v12 = vpop.f32.mrf.mxu1 }
 0x203   :  { %v2737_v13 = vpop.f32.mrf.mxu3 }
 0x204   :  { %v1546_v14 = vadd.f32 %v2737_v13, %v1349_v52  ;;  %v1898_v13 = vld [vmem:[%s2770_s4] sm:$0xf] }
 0x205   :  { %v1524_v15 = vpop.f32.mrf.mxu2 }
 0x208   :  { %v1641_v30 = vpop.f32.mrf.mxu0  ;;  %v1654_v16 = vpop.f32.mrf.mxu1 }
 0x209   :  { %v1736_v5 = vadd.f32 %v1641_v30, %v1539_v6  ;;  %v1737_v25 = vadd.f32 %v1654_v16, %v1540_v1  ;;  %v1781_v16 = vld [vmem:[#allocation1 + $0x24] sm:$0xff] }
 0x20b   :  { %v1750_v33 = vadd.f32 %v2739_v26, %v1736_v5  ;;  %v1751_v34 = vadd.f32 %v2739_v26, %v1737_v25  ;;  %v1537_v36 = vpop.f32.mrf.mxu3  ;;  %v1782_v5 = vld [vmem:[#allocation1 + $0x2d] sm:$0xff] }
 0x20d   :  { %v1667_v17 = vpop.f32.mrf.mxu2  ;;  %v1758_v28 = vmax.f32 %v1750_v33, 0.0  ;;  %v1759_v31 = vmax.f32 %v1751_v34, 0.0  ;;  %v1784_v34 = vld [vmem:[#allocation1 + $0x3f] sm:$0xff] }
 0x20e   :  { %v1738_v32 = vadd.f32 %v1667_v17, %v1541_v35  ;;  %v1909_v35 = vsel %vm1907_vm10, %v1898_v13, 0 }
 0x20f   :  { %v1767_v39 = vpack.c.bf16 %v1758_v28, %v1758_v28  ;;  %v1768_v29 = vpack.c.bf16 %v1759_v31, %v1759_v31 }
 0x210   :  { %v1752_v43 = vadd.f32 %v2739_v26, %v1738_v32  ;;  %v1643_v45 = vpop.f32.mrf.mxu0  ;;  %v1656_v46 = vpop.f32.mrf.mxu1 }
 0x211   :  { %1800 = vmatpush.bf16.xpose.msra.mxu0 %v1767_v39  ;;  %1813 = vmatpush.bf16.xpose.msra.mxu1 %v1768_v29 }
 0x212   :  { %v1760_v4 = vmax.f32 %v1752_v43, 0.0 }
 0x213   :  { %v1680_v42 = vpop.f32.mrf.mxu3 }
 0x214   :  { %v1769_v20 = vpack.c.bf16 %v1760_v4, %v1760_v4  ;;  %v1739_v53 = vadd.f32 %v1680_v42, %v1542_v49 }
 0x215   :  { %v1669_v56 = vpop.f32.mrf.mxu2 }
 0x216   :  { %1826 = vmatpush.bf16.xpose.msra.mxu2 %v1769_v20  ;;  %v1753_v59 = vadd.f32 %v2739_v26, %v1739_v53 }
 0x218   :  { %v1693_v37 = vpop.f32.mrf.mxu0  ;;  %v1706_v22 = vpop.f32.mrf.mxu1  ;;  %1801 = vmatmul.bf16.vlgmr.msra.gmra.mxu0 %v1777_v50  ;;  %1814 = vmatmul.bf16.vlgmr.msra.gmra.mxu1 %v1778_v23  ;;  %v1761_v24 = vmax.f32 %v1753_v59, 0.0  ;;  %v2154_v59 = vld [vmem:[%s2771_s5] ss:$0 sm:$0xff] }
 0x219   :  { %v1740_v60 = vadd.f32 %v1693_v37, %v1543_v54  ;;  %v1741_v19 = vadd.f32 %v1706_v22, %v1544_v55 }
 0x21a   :  { %v1770_v51 = vpack.c.bf16 %v1761_v24, %v1761_v24 }
 0x21b   :  { %v1754_v18 = vadd.f32 %v2739_v26, %v1740_v60  ;;  %v1755_v61 = vadd.f32 %v2739_v26, %v1741_v19  ;;  %v1682_v21 = vpop.f32.mrf.mxu3 }
 0x21c   :  { %1839 = vmatpush.bf16.xpose.msra.mxu3 %v1770_v51 }
 0x21d   :  { %v1762_v63 = vmax.f32 %v1754_v18, 0.0  ;;  %v1763_v0 = vmax.f32 %v1755_v61, 0.0  ;;  %v1719_v58 = vpop.f32.mrf.mxu2  ;;  %1827 = vmatmul.bf16.vlgmr.msra.gmra.mxu2 %v1779_v41 }
 0x21e   :  { %v1742_v7 = vadd.f32 %v1719_v58, %v1545_v62 }
 0x21f   :  { %v1771_v8 = vpack.c.bf16 %v1762_v63, %v1762_v63  ;;  %v1772_v9 = vpack.c.bf16 %v1763_v0, %v1763_v0 }
 0x220   :  { %v1756_v11 = vadd.f32 %v2739_v26, %v1742_v7  ;;  %v1695_v12 = vpop.f32.mrf.mxu0  ;;  %v1708_v38 = vpop.f32.mrf.mxu1 }
 0x221   :  { %1852 = vmatpush.bf16.xpose.msrb.mxu0 %v1771_v8  ;;  %1865 = vmatpush.bf16.xpose.msrb.mxu1 %v1772_v9 }
 0x222   :  { %v1764_v10 = vmax.f32 %v1756_v11, 0.0 }
 0x223   :  { %v1732_v6 = vpop.f32.mrf.mxu3  ;;  %1840 = vmatmul.bf16.vlgmr.msra.gmra.mxu3 %v1780_v2 }
 0x224   :  { %v1773_v15 = vpack.c.bf16 %v1764_v10, %v1764_v10  ;;  %v1743_v1 = vadd.f32 %v1732_v6, %v1546_v14 }
 0x225   :  { %v1721_v30 = vpop.f32.mrf.mxu2 }
 0x226   :  { %1878 = vmatpush.bf16.xpose.msrb.mxu2 %v1773_v15  ;;  %v1757_v25 = vadd.f32 %v2739_v26, %v1743_v1 }
 0x228   :  { %1853 = vmatmul.bf16.vlgmr.msrb.gmra.mxu0 %v1781_v16  ;;  %1866 = vmatmul.bf16.vlgmr.msrb.gmra.mxu1 %v1782_v5  ;;  %v1765_v27 = vmax.f32 %v1757_v25, 0.0 }
 0x229   :  { %1918 = vmatpush.bf16.msra.mxu0 %v1909_v35 }
 0x22a   :  { %v1774_v57 = vpack.c.bf16 %v1765_v27, %v1765_v27 }
 0x22b   :  { %v1734_v33 = vpop.f32.mrf.mxu3 }
 0x22c   :  { %1891 = vmatpush.bf16.xpose.msrb.mxu3 %v1774_v57 }
 0x22d   :  { %1879 = vmatmul.bf16.vlgmr.msrb.gmra.mxu2 %v1783_v48 }
 0x233   :  { %1892 = vmatmul.bf16.vlgmr.msrb.gmra.mxu3 %v1784_v34 }
 0x295   :  { %v1802_v36 = vpop.f32.mrf.mxu0  ;;  %v1815_v17 = vpop.f32.mrf.mxu1 }
 0x296   :  { %v1816_v29 = vadd.f32 %v1815_v17, %v1802_v36 }
 0x29d   :  { %v1804_v26 = vpop.f32.mrf.mxu0  ;;  %v1817_v28 = vpop.f32.mrf.mxu1 }
 0x2a0   :  { %v1828_v31 = vpop.f32.mrf.mxu2 }
 0x2a1   :  { %v1829_v46 = vadd.f32 %v1828_v31, %v1816_v29 }
 0x2a5   :  { %v1854_v32 = vpop.f32.mrf.mxu0  ;;  %v1867_v39 = vpop.f32.mrf.mxu1 }
 0x2a6   :  { %v1841_v43 = vpop.f32.mrf.mxu3 }
 0x2a7   :  { %v1842_v47 = vadd.f32 %v1841_v43, %v1829_v46 }
 0x2a8   :  { %v1830_v45 = vpop.f32.mrf.mxu2 }
 0x2a9   :  { %v1855_v42 = vadd.f32 %v1854_v32, %v1842_v47 }
 0x2ab   :  { %v1868_v3 = vadd.f32 %v1867_v39, %v1855_v42 }
 0x2ad   :  { %v1856_v4 = vpop.f32.mrf.mxu0  ;;  %v1869_v49 = vpop.f32.mrf.mxu1 }
 0x2ae   :  { %v1843_v20 = vpop.f32.mrf.mxu3 }
 0x2b0   :  { %v1880_v44 = vpop.f32.mrf.mxu2 }
 0x2b1   :  { %v1881_v53 = vadd.f32 %v1880_v44, %v1868_v3 }
 0x2b6   :  { %v1893_v56 = vpop.f32.mrf.mxu3 }
 0x2b7   :  { %v1894_v50 = vadd.f32 %v1893_v56, %v1881_v53 }
 0x2b8   :  { %v1882_v23 = vpop.f32.mrf.mxu2 }
 0x2b9   :  { %v1897_v54 = vpack.c.bf16 %v1894_v50, %v1894_v50 }
 0x2bb   :  { %2021 = vmatmul.msk.bf16.vlgmr.msra.gmra.mxu0 %vm1903_vm11, %v1897_v54 }
 0x2be   :  { %v1895_v55 = vpop.f32.mrf.mxu3 }
 0x338   :  { %v1920_v37 = vpop.f32.mrf.mxu0 }
 0x339   :  { %v1921_v22 = vadd.f32 %v2154_v59, %v1920_v37 }
 0x33b   :  { %1924 = vst [vmem:[#allocation2] sm:$0x3] %v1921_v22 }
 0x33c   :  { %1935 = dma.vmem_to_hbm [thread:$0]  %s1931_s30, 32, %s1933_s9, [#allocation3]  }
 0x340   :  { %v1922_v24 = vpop.f32.mrf.mxu0 }
 0x341   :  { %2179 = dma.done.wait [#allocation3], 32  }
 0x342   :  { %2180 = vsyncadd [#allocation3], 4294967264 }
 0x343   :  { %1940 = vsyncpa [#allocation3], 1 }

</bundles_post_ra>
